<compile_context>
chip_gen: v5e
topology: v5e:2x2
jax: 0.10.0
libtpu: 0.0.40
codegen_flags: <defaults>
</compile_context>

<pallas_src>
import functools

import jax
import jax.numpy as jnp
from jax.experimental import pallas as pl
from jax.experimental.pallas import tpu as pltpu


def _confidence_ce_kernel(weak_ref, strong_ref, cnt_ref, ce_ref, *,
                          threshold, batch):
    """One batch tile -> per-class (count, ce_sum) partials."""
    pid = pl.program_id(0)

    weak = weak_ref[...].astype(jnp.float32)      # (tb, C)
    strong = strong_ref[...].astype(jnp.float32)  # (tb, C)
    tb, num_classes = weak.shape

    # Row-validity mask for the ragged last tile (no physical padding is done
    # in the wrapper).  Out-of-bounds rows contain garbage VMEM, so zero them
    # before any exp to keep the arithmetic finite (0 * NaN would otherwise
    # poison the partial sums).
    row = jax.lax.broadcasted_iota(jnp.int32, (tb, 1), 0)
    valid = (pid * tb + row) < batch                                   # (tb, 1)
    weak = jnp.where(valid, weak, 0.0)
    strong = jnp.where(valid, strong, 0.0)

    # ---- softmax statistics of the weak logits (reduce over classes).
    w_max = jnp.max(weak, axis=1, keepdims=True)                       # (tb, 1)
    w_sum = jnp.sum(jnp.exp(weak - w_max), axis=1, keepdims=True)      # (tb, 1)

    # Confidence mask.  max softmax prob == 1 / w_sum (the max exp term is 1),
    # so  max_prob > threshold  <=>  w_sum < 1/threshold  (threshold > 0);
    # this drops the per-row divide.  Borderline samples may differ from the
    # reference by f32 rounding only.
    if threshold > 0.0:
        conf = w_sum < jnp.float32(1.0 / threshold)
    else:  # max_prob > 0 >= threshold always
        conf = jnp.ones_like(w_sum, dtype=jnp.bool_)
    maskf = jnp.where(jnp.logical_and(conf, valid),
                      jnp.float32(1.0), jnp.float32(0.0))              # (tb, 1)

    # ---- pseudo-labels: first-occurrence argmax over classes.
    col = jax.lax.broadcasted_iota(jnp.int32, (tb, num_classes), 1)
    is_max = weak == w_max
    target = jnp.min(jnp.where(is_max, col, num_classes),
                     axis=1, keepdims=True)                            # (tb, 1)
    onehot = (col == target).astype(jnp.float32)                       # (tb, C)

    # ---- cross-entropy of the strong logits against the pseudo-labels.
    s_max = jnp.max(strong, axis=1, keepdims=True)                     # (tb, 1)
    s_lse = jnp.log(jnp.sum(jnp.exp(strong - s_max), axis=1,
                            keepdims=True)) + s_max                    # (tb, 1)
    s_tgt = jnp.sum(strong * onehot, axis=1, keepdims=True)            # (tb, 1)
    ce = s_lse - s_tgt                                                 # (tb, 1)

    # ---- per-class masked partials for this tile (independent per grid step,
    #      so the grid axis can be fully parallel / megacore-split).
    onehot_m = onehot * maskf                                          # (tb, C)
    cnt_ref[...] = jnp.sum(onehot_m, axis=0, keepdims=True)            # (1, C)
    ce_ref[...] = jnp.sum(onehot_m * ce, axis=0, keepdims=True)        # (1, C)


def confidence_based_ce(anchors_weak, anchors_strong, *, threshold,
                        apply_class_balancing, block_b=8192):
    """Pallas equivalent of ConfidenceBasedCE.forward.  Returns a scalar loss.

    `anchors_weak` / `anchors_strong` are (B, C) logits (f32 or bf16; keep
    them bf16 if the producer already emits bf16 - in-kernel math is f32).
    `block_b` is the number of batch rows per grid step.
    """
    assert anchors_weak.shape == anchors_strong.shape
    assert anchors_weak.ndim == 2
    B, C = anchors_weak.shape

    # Tile-size selection: as many rows per block as fit a ~4 MiB VMEM block
    # (the minor class dim pads to 128 lanes in VMEM); 2 inputs x 2 pipeline
    # buffers then stay ~<=16 MiB, well under the 32 MiB scoped limit on every
    # generation including v7x.
    padded_c = ((C + 127) // 128) * 128
    cap = (4 * 1024 * 1024) // (4 * padded_c)
    cap = max(8, (cap // 8) * 8)
    tb = max(8, (min(int(block_b), cap) // 8) * 8)
    if B <= tb:
        tb = B                    # whole batch in a single block
    n_tiles = pl.cdiv(B, tb)

    kernel = functools.partial(_confidence_ce_kernel,
                               threshold=float(threshold), batch=B)

    cnt_part, ce_part = pl.pallas_call(
        kernel,
        out_shape=(jax.ShapeDtypeStruct((n_tiles, 1, C), jnp.float32),
                   jax.ShapeDtypeStruct((n_tiles, 1, C), jnp.float32)),
        grid_spec=pltpu.PrefetchScalarGridSpec(
            num_scalar_prefetch=0,
            grid=(n_tiles,),
            in_specs=[pl.BlockSpec((tb, C), lambda i: (i, 0)),
                      pl.BlockSpec((tb, C), lambda i: (i, 0))],
            out_specs=[pl.BlockSpec((None, 1, C), lambda i: (i, 0, 0)),
                       pl.BlockSpec((None, 1, C), lambda i: (i, 0, 0))],
        ),
        compiler_params=pltpu.CompilerParams(
            # Fully independent tiles -> "parallel": on v7x the runtime can
            # shard the batch tiles across both TensorCores.
            dimension_semantics=("parallel",),
            vmem_limit_bytes=32 * 1024 * 1024),
    )(anchors_weak, anchors_strong)

    # O(C) epilogue: combine per-tile partials and take the weighted mean,
    # matching F.cross_entropy(weight=..., reduction='mean').
    counts = jnp.sum(cnt_part, axis=(0, 1))    # (C,)
    ce_sums = jnp.sum(ce_part, axis=(0, 1))    # (C,)

    # TODO(synk): the PyTorch module raises ValueError when the confidence
    # mask is all zeros; here the denominator is 0 and the loss is NaN.
    if apply_class_balancing:
        # weight_k = n / count_k for classes present among masked targets
        #   => loss = (1/#present) * sum_k ce_sum_k / count_k
        present = counts > 0.0
        per_cls = jnp.where(present, ce_sums / jnp.maximum(counts, 1.0), 0.0)
        return jnp.sum(per_cls) / jnp.sum(present.astype(jnp.float32))
    else:
        return jnp.sum(ce_sums) / jnp.sum(counts)


def _reference(anchors_weak, anchors_strong, *, threshold,
               apply_class_balancing):
    """Pure-JAX reference mirroring the PyTorch semantics (for verification)."""
    probs = jax.nn.softmax(anchors_weak.astype(jnp.float32), axis=1)
    max_prob = jnp.max(probs, axis=1)
    target = jnp.argmax(probs, axis=1)
    maskf = (max_prob > threshold).astype(jnp.float32)
    n = jnp.sum(maskf)
    c = anchors_weak.shape[1]
    onehot = jax.nn.one_hot(target, c, dtype=jnp.float32)
    if apply_class_balancing:
        counts = jnp.sum(onehot * maskf[:, None], axis=0)
        weight = jnp.where(counts > 0, n / jnp.maximum(counts, 1.0), 1.0)
    else:
        weight = jnp.ones((c,), jnp.float32)
    logp = jax.nn.log_softmax(anchors_strong.astype(jnp.float32), axis=1)
    ce = -jnp.sum(logp * onehot, axis=1)
    w_row = weight[target]
    return jnp.sum(ce * w_row * maskf) / jnp.sum(w_row * maskf)


if __name__ == "__main__":
    key = jax.random.PRNGKey(0)
    k1, k2 = jax.random.split(key)
    B, C = 200, 10   # non-multiple-of-128 batch exercises the masked remainder
    anchors_weak = jax.random.normal(k1, (B, C), dtype=jnp.float32) * 2.0
    anchors_strong = jax.random.normal(k2, (B, C), dtype=jnp.float32)
    threshold = 0.15

    for balance in (True, False):
        for blk in (8192, 128):   # single-block path and ragged 2-tile path
            loss = confidence_based_ce(
                anchors_weak, anchors_strong, threshold=threshold,
                apply_class_balancing=balance, block_b=blk)
            loss = jax.block_until_ready(loss)
            ref = _reference(anchors_weak, anchors_strong, threshold=threshold,
                             apply_class_balancing=balance)
            assert jnp.allclose(loss, ref, rtol=1e-4, atol=1e-5), (
                balance, blk, loss, ref)

    print("KERNEL_OK")
</pallas_src>

<mosaic_0001>
module attributes {stable_mosaic.version = 11 : i64} {
  func.func @_confidence_ce_kernel(%arg0: i32, %arg1: memref<200x10xf32, #tpu.memory_space<vmem>>, %arg2: memref<200x10xf32, #tpu.memory_space<vmem>>, %arg3: memref<1x1x10xf32, #tpu.memory_space<vmem>>, %arg4: memref<1x1x10xf32, #tpu.memory_space<vmem>>) attributes {dimension_semantics = [#tpu.dimension_semantics<parallel>], iteration_bounds = array<i64: 1>, scalar_prefetch = 0 : i64, scratch_operands = 0 : i64, tpu.core_type = #tpu.core_type<tc>, window_params = [{transform_indices = @transform_0, window_bounds = array<i64: 200, 10>}, {transform_indices = @transform_1, window_bounds = array<i64: 200, 10>}, {transform_indices = @transform_2, window_bounds = array<i64: 1, 1, 10>}, {transform_indices = @transform_3, window_bounds = array<i64: 1, 1, 10>}]} {
    %c0 = arith.constant 0 : index
    %c0_0 = arith.constant 0 : index
    %0 = vector.load %arg1[%c0, %c0_0] : memref<200x10xf32, #tpu.memory_space<vmem>>, vector<200x10xf32>
    %c0_1 = arith.constant 0 : index
    %c0_2 = arith.constant 0 : index
    %1 = vector.load %arg2[%c0_1, %c0_2] : memref<200x10xf32, #tpu.memory_space<vmem>>, vector<200x10xf32>
    %2 = tpu.iota {dimensions = array<i32: 0>} : vector<200x1xi32>
    %c200_i32 = arith.constant 200 : i32
    %3 = arith.muli %arg0, %c200_i32 : i32
    %4 = vector.broadcast %3 : i32 to vector<200x1xi32>
    %5 = arith.addi %4, %2 : vector<200x1xi32>
    %c200_i32_3 = arith.constant 200 : i32
    %6 = vector.broadcast %c200_i32_3 : i32 to vector<200x1xi32>
    %7 = arith.cmpi slt, %5, %6 : vector<200x1xi32>
    %cst = arith.constant 0.000000e+00 : f32
    %8 = vector.shape_cast %7 : vector<200x1xi1> to vector<200x1xi1>
    %9 = vector.broadcast %8 : vector<200x1xi1> to vector<200x10xi1>
    %10 = vector.broadcast %cst : f32 to vector<200x10xf32>
    %11 = arith.select %9, %0, %10 : vector<200x10xi1>, vector<200x10xf32>
    %cst_4 = arith.constant 0.000000e+00 : f32
    %12 = vector.shape_cast %7 : vector<200x1xi1> to vector<200x1xi1>
    %13 = vector.broadcast %12 : vector<200x1xi1> to vector<200x10xi1>
    %14 = vector.broadcast %cst_4 : f32 to vector<200x10xf32>
    %15 = arith.select %13, %1, %14 : vector<200x10xi1>, vector<200x10xf32>
    %cst_5 = arith.constant dense<0xFF800000> : vector<200xf32>
    %16 = vector.multi_reduction <maximumf>, %11, %cst_5 [1] : vector<200x10xf32> to vector<200xf32>
    %17 = vector.shape_cast %16 : vector<200xf32> to vector<200x1xf32>
    %18 = vector.broadcast %17 : vector<200x1xf32> to vector<200x10xf32>
    %19 = arith.subf %11, %18 : vector<200x10xf32>
    %20 = math.exp %19 : vector<200x10xf32>
    %cst_6 = arith.constant dense<0.000000e+00> : vector<200xf32>
    %21 = vector.multi_reduction <add>, %20, %cst_6 [1] : vector<200x10xf32> to vector<200xf32>
    %22 = vector.shape_cast %21 : vector<200xf32> to vector<200x1xf32>
    %cst_7 = arith.constant 6.66666651 : f32
    %23 = vector.broadcast %cst_7 : f32 to vector<200x1xf32>
    %24 = arith.cmpf olt, %22, %23 : vector<200x1xf32>
    %25 = arith.andi %24, %7 : vector<200x1xi1>
    %cst_8 = arith.constant 1.000000e+00 : f32
    %cst_9 = arith.constant 0.000000e+00 : f32
    %26 = vector.broadcast %cst_8 : f32 to vector<200x1xf32>
    %27 = vector.broadcast %cst_9 : f32 to vector<200x1xf32>
    %28 = arith.select %25, %26, %27 : vector<200x1xi1>, vector<200x1xf32>
    %29 = tpu.iota {dimensions = array<i32: 1>} : vector<200x10xi32>
    %30 = vector.broadcast %17 : vector<200x1xf32> to vector<200x10xf32>
    %31 = arith.cmpf oeq, %11, %30 : vector<200x10xf32>
    %c10_i32 = arith.constant 10 : i32
    %32 = vector.broadcast %c10_i32 : i32 to vector<200x10xi32>
    %33 = arith.select %31, %29, %32 : vector<200x10xi1>, vector<200x10xi32>
    %cst_10 = arith.constant dense<2147483647> : vector<200xi32>
    %34 = vector.multi_reduction <minsi>, %33, %cst_10 [1] : vector<200x10xi32> to vector<200xi32>
    %35 = vector.shape_cast %34 : vector<200xi32> to vector<200x1xi32>
    %36 = vector.broadcast %35 : vector<200x1xi32> to vector<200x10xi32>
    %37 = arith.cmpi eq, %29, %36 : vector<200x10xi32>
    %38 = arith.extui %37 : vector<200x10xi1> to vector<200x10xi32>
    %39 = arith.sitofp %38 : vector<200x10xi32> to vector<200x10xf32>
    %cst_11 = arith.constant dense<0xFF800000> : vector<200xf32>
    %40 = vector.multi_reduction <maximumf>, %15, %cst_11 [1] : vector<200x10xf32> to vector<200xf32>
    %41 = vector.shape_cast %40 : vector<200xf32> to vector<200x1xf32>
    %42 = vector.broadcast %41 : vector<200x1xf32> to vector<200x10xf32>
    %43 = arith.subf %15, %42 : vector<200x10xf32>
    %44 = math.exp %43 : vector<200x10xf32>
    %cst_12 = arith.constant dense<0.000000e+00> : vector<200xf32>
    %45 = vector.multi_reduction <add>, %44, %cst_12 [1] : vector<200x10xf32> to vector<200xf32>
    %46 = vector.shape_cast %45 : vector<200xf32> to vector<200x1xf32>
    %47 = math.log %46 : vector<200x1xf32>
    %48 = arith.addf %47, %41 : vector<200x1xf32>
    %49 = arith.mulf %15, %39 : vector<200x10xf32>
    %cst_13 = arith.constant dense<0.000000e+00> : vector<200xf32>
    %50 = vector.multi_reduction <add>, %49, %cst_13 [1] : vector<200x10xf32> to vector<200xf32>
    %51 = vector.shape_cast %50 : vector<200xf32> to vector<200x1xf32>
    %52 = arith.subf %48, %51 : vector<200x1xf32>
    %53 = vector.broadcast %28 : vector<200x1xf32> to vector<200x10xf32>
    %54 = arith.mulf %39, %53 : vector<200x10xf32>
    %cst_14 = arith.constant dense<0.000000e+00> : vector<10xf32>
    %55 = vector.multi_reduction <add>, %54, %cst_14 [0] : vector<200x10xf32> to vector<10xf32>
    %56 = vector.shape_cast %55 : vector<10xf32> to vector<1x10xf32>
    %c0_15 = arith.constant 0 : index
    %c0_16 = arith.constant 0 : index
    %c0_17 = arith.constant 0 : index
    %57 = vector.load %arg3[%c0_15, %c0_16, %c0_17] : memref<1x1x10xf32, #tpu.memory_space<vmem>>, vector<1x1x10xf32>
    %58 = vector.shape_cast %57 : vector<1x1x10xf32> to vector<1x10xf32>
    %59 = vector.shape_cast %56 : vector<1x10xf32> to vector<1x1x10xf32>
    tpu.vector_store %arg3[%c0_15, %c0_16, %c0_17], %59 {strides = array<i32>} : memref<1x1x10xf32, #tpu.memory_space<vmem>>, vector<1x1x10xf32>,
    %60 = vector.broadcast %52 : vector<200x1xf32> to vector<200x10xf32>
    %61 = arith.mulf %54, %60 : vector<200x10xf32>
    %cst_18 = arith.constant dense<0.000000e+00> : vector<10xf32>
    %62 = vector.multi_reduction <add>, %61, %cst_18 [0] : vector<200x10xf32> to vector<10xf32>
    %63 = vector.shape_cast %62 : vector<10xf32> to vector<1x10xf32>
    %c0_19 = arith.constant 0 : index
    %c0_20 = arith.constant 0 : index
    %c0_21 = arith.constant 0 : index
    %64 = vector.load %arg4[%c0_19, %c0_20, %c0_21] : memref<1x1x10xf32, #tpu.memory_space<vmem>>, vector<1x1x10xf32>
    %65 = vector.shape_cast %64 : vector<1x1x10xf32> to vector<1x10xf32>
    %66 = vector.shape_cast %63 : vector<1x10xf32> to vector<1x1x10xf32>
    tpu.vector_store %arg4[%c0_19, %c0_20, %c0_21], %66 {strides = array<i32>} : memref<1x1x10xf32, #tpu.memory_space<vmem>>, vector<1x1x10xf32>,
    return
  }
  func.func @transform_0(%arg0: i32) -> (i32, i32) {
    %c0_i32 = arith.constant 0 : i32
    %c0_i32_0 = arith.constant 0 : i32
    return %arg0, %c0_i32 : i32, i32
  }
  func.func @transform_1(%arg0: i32) -> (i32, i32) {
    %c0_i32 = arith.constant 0 : i32
    %c0_i32_0 = arith.constant 0 : i32
    return %arg0, %c0_i32 : i32, i32
  }
  func.func @transform_2(%arg0: i32) -> (i32, i32, i32) {
    %c0_i32 = arith.constant 0 : i32
    %c0_i32_0 = arith.constant 0 : i32
    %c0_i32_1 = arith.constant 0 : i32
    return %arg0, %c0_i32, %c0_i32_0 : i32, i32, i32
  }
  func.func @transform_3(%arg0: i32) -> (i32, i32, i32) {
    %c0_i32 = arith.constant 0 : i32
    %c0_i32_0 = arith.constant 0 : i32
    %c0_i32_1 = arith.constant 0 : i32
    return %arg0, %c0_i32, %c0_i32_0 : i32, i32, i32
  }
}

</mosaic_0001>

<bundles_post_ra>
// kernel: tpu_custom_call.1
= control target key start
LH: loop header
LB: loop body
LE: loop exit
PB: predicated region body
PF: predicated region fallthrough
CT: control target
= control target key end

     0   :  { %9 = vsyncpa [#allocation3], 0  ;;  %vm243_vm0 = vcmask 80896   ;;  %s3441_s0 = inlined_call_operand.vmem [shape: f32[200,10], index: 0, kind: input, shape index: {}]   ;;  %s3442_s1 = inlined_call_operand.vmem [shape: f32[200,10], index: 1, kind: input, shape index: {}]   ;;  %s3443_s2 = inlined_call_operand.hbm [shape: f32[1,1,10], index: 2, kind: output, shape index: {0}]   ;;  %s3444_s3 = inlined_call_operand.hbm [shape: f32[1,1,10], index: 3, kind: output, shape index: {1}]  }
   0x1   :  { %v1923_v0 = vld [vmem:[%s3441_s0 + $0x20] sm:$0xff]  ;;  %v1928_v1 = vld [vmem:[%s3441_s0 + $0x10] sm:$0xff]  ;;  %v1944_v6 = vld [vmem:[%s3441_s0 + $0x28] sm:$0xff] }
   0x2   :  { %v1933_v2 = vld [vmem:[%s3441_s0] sm:$0xff]  ;;  %v256_v3 = vsel %vm243_vm0, %v1923_v0, -inf  ;;  %v250_v4 = vsel %vm243_vm0, %v1928_v1, -inf  ;;  %v1949_v7 = vld [vmem:[%s3441_s0 + $0x18] sm:$0xff]  ;;  %v1954_v8 = vld [vmem:[%s3441_s0 + $0x8] sm:$0xff] }
   0x3   :  { %v244_v5 = vsel %vm243_vm0, %v1933_v2, -inf  ;;  %257 = vmax.xlane.f32.xlu2 %v256_v3  ;;  %251 = vmax.xlane.f32.xlu1 %v250_v4 }
   0x4   :  { %245 = vmax.xlane.f32.xlu0 %v244_v5 }
   0x5   :  { %10 = vsyncpa [#allocation5], 0  ;;  %v259_v9 = vsel %vm243_vm0, %v1944_v6, -inf  ;;  %v253_v10 = vsel %vm243_vm0, %v1949_v7, -inf  ;;  %v247_v11 = vsel %vm243_vm0, %v1954_v8, -inf  ;;  %v1965_v12 = vld [vmem:[%s3441_s0 + $0x40] sm:$0xff]  ;;  %v544_v50 = vlaneseq }
   0x6   :  { %v1970_v13 = vld [vmem:[%s3441_s0 + $0x38] sm:$0xff]  ;;  %v1975_v14 = vld [vmem:[%s3441_s0 + $0x30] sm:$0xff]  ;;  %v268_v15 = vsel %vm243_vm0, %v1965_v12, -inf  ;;  %v1996_v20 = vld [vmem:[%s3441_s0 + $0x48] sm:$0xff]  ;;  %s1641_s5 = sshll.u32 %s3443_s2, 4  ;;  %s1898_s6 = smov [#allocation2]   ;;  %s1642_s5 = int_to_ptr.hbm [resolvable:$true] %s1641_s5 }
   0x7   :  { %v265_v16 = vsel %vm243_vm0, %v1970_v13, -inf  ;;  %v262_v17 = vsel %vm243_vm0, %v1975_v14, -inf  ;;  %v1986_v18 = vld [vmem:[%s3441_s0 + $0x58] sm:$0xff]  ;;  %v1991_v19 = vld [vmem:[%s3441_s0 + $0x50] sm:$0xff]  ;;  %v271_v23 = vsel %vm243_vm0, %v1996_v20, -inf  ;;  %v2012_v25 = vld [vmem:[%s3441_s0 + $0x68] sm:$0xff] }
   0x8   :  { %v277_v21 = vsel %vm243_vm0, %v1986_v18, -inf  ;;  %v274_v22 = vsel %vm243_vm0, %v1991_v19, -inf  ;;  %v2007_v24 = vld [vmem:[%s3441_s0 + $0x70] sm:$0xff]  ;;  %v2017_v26 = vld [vmem:[%s3441_s0 + $0x60] sm:$0xff]  ;;  %v283_v28 = vsel %vm243_vm0, %v2012_v25, -inf  ;;  %v2028_v30 = vld [vmem:[%s3441_s0 + $0x88] sm:$0xff] }
   0x9   :  { %v286_v27 = vsel %vm243_vm0, %v2007_v24, -inf  ;;  %v280_v29 = vsel %vm243_vm0, %v2017_v26, -inf  ;;  %v2033_v31 = vld [vmem:[%s3441_s0 + $0x80] sm:$0xff]  ;;  %v2038_v32 = vld [vmem:[%s3441_s0 + $0x78] sm:$0xff]  ;;  %v295_v33 = vsel %vm243_vm0, %v2028_v30, -inf  ;;  %v2059_v38 = vld [vmem:[%s3441_s0 + $0x90] sm:$0xff] }
   0xa   :  { %v292_v34 = vsel %vm243_vm0, %v2033_v31, -inf  ;;  %v289_v35 = vsel %vm243_vm0, %v2038_v32, -inf  ;;  %v2049_v36 = vld [vmem:[%s3441_s0 + $0xa0] sm:$0xff]  ;;  %v2054_v37 = vld [vmem:[%s3441_s0 + $0x98] sm:$0xff]  ;;  %v298_v41 = vsel %vm243_vm0, %v2059_v38, -inf  ;;  %v2075_v43 = vld [vmem:[%s3441_s0 + $0xb0] sm:$0xff] }
   0xb   :  { %260 = vmax.xlane.f32.xlu2 %v259_v9  ;;  %254 = vmax.xlane.f32.xlu1 %v253_v10  ;;  %v304_v39 = vsel %vm243_vm0, %v2049_v36, -inf  ;;  %v301_v40 = vsel %vm243_vm0, %v2054_v37, -inf  ;;  %v2070_v42 = vld [vmem:[%s3441_s0 + $0xb8] sm:$0xff]  ;;  %v2080_v44 = vld [vmem:[%s3441_s0 + $0xa8] sm:$0xff]  ;;  %v310_v46 = vsel %vm243_vm0, %v2075_v43, -inf  ;;  %v2091_v48 = vld [vmem:[%s3441_s0 + $0xc0] sm:$0xff] }
   0xc   :  { %248 = vmax.xlane.f32.xlu0 %v247_v11  ;;  %v313_v45 = vsel %vm243_vm0, %v2070_v42, -inf  ;;  %v307_v47 = vsel %vm243_vm0, %v2080_v44, -inf  ;;  %v316_v49 = vsel %vm243_vm0, %v2091_v48, -inf  ;;  %v2095_v51 = vand.u32 127, %v544_v50  ;;  %s1639_s7 = sshll.u32 %s1898_s6, 4  ;;  %s1899_s2 = smov [#allocation4]   ;;  %s1640_s7 = int_to_ptr.vmem [resolvable:$true] %s1639_s7 }
   0xd   :  { %s1650_s8 = sshll.u32 %s1899_s2, 4  ;;  %s1652_s10 = sshll.u32 %s3444_s3, 4  ;;  %s1651_s8 = int_to_ptr.vmem [resolvable:$true] %s1650_s8  ;;  %s1653_s10 = int_to_ptr.hbm [resolvable:$true] %s1652_s10 }
  0x13   :  { %269 = vmax.xlane.f32.xlu2 %v268_v15  ;;  %266 = vmax.xlane.f32.xlu1 %v265_v16 }
  0x14   :  { %263 = vmax.xlane.f32.xlu0 %v262_v17 }
  0x1b   :  { %278 = vmax.xlane.f32.xlu2 %v277_v21  ;;  %275 = vmax.xlane.f32.xlu1 %v274_v22 }
  0x1c   :  { %272 = vmax.xlane.f32.xlu0 %v271_v23 }
  0x23   :  { %287 = vmax.xlane.f32.xlu2 %v286_v27  ;;  %284 = vmax.xlane.f32.xlu1 %v283_v28 }
  0x24   :  { %281 = vmax.xlane.f32.xlu0 %v280_v29 }
  0x2b   :  { %296 = vmax.xlane.f32.xlu2 %v295_v33  ;;  %293 = vmax.xlane.f32.xlu1 %v292_v34 }
  0x2c   :  { %290 = vmax.xlane.f32.xlu0 %v289_v35 }
  0x33   :  { %305 = vmax.xlane.f32.xlu2 %v304_v39  ;;  %302 = vmax.xlane.f32.xlu1 %v301_v40 }
  0x34   :  { %299 = vmax.xlane.f32.xlu0 %v298_v41 }
  0x3b   :  { %314 = vmax.xlane.f32.xlu2 %v313_v45  ;;  %311 = vmax.xlane.f32.xlu1 %v310_v46 }
  0x3c   :  { %308 = vmax.xlane.f32.xlu0 %v307_v47 }
  0x44   :  { %317 = vmax.xlane.f32.xlu0 %v316_v49 }
  0x76   :  { %v2097_v52 = vpop.xlane.xlu2 %257  ;;  %v2099_v53 = vpop.xlane.xlu1 %251 }
  0x77   :  { %v321_v54 = vsub.f32 %v1928_v1, %v2099_v53  ;;  %v246_v55 = vpop.xlane.xlu0 %245  ;;  %v323_v16 = vsub.f32 %v1923_v0, %v2097_v52  ;;  %vm548_vm2 = vcmp.eq.f32.partialorder %v1928_v1, %v2099_v53  ;;  %vm550_vm7 = vcmp.eq.f32.partialorder %v1923_v0, %v2097_v52 }
  0x78   :  { %v319_v56 = vsub.f32 %v1933_v2, %v246_v55  ;;  %vm546_vm1 = vcmp.eq.f32.partialorder %v1933_v2, %v246_v55 }
  0x79   :  { %v348_v57 = vmul.f32 1.442695, %v321_v54  ;;  %v571_v58 = vsel %vm546_vm1, %v2095_v51, 10  ;;  %v352_v27 = vmul.f32 1.442695, %v323_v16 }
  0x7a   :  { %v344_v59 = vmul.f32 1.442695, %v319_v56  ;;  %v2107_v60 = vsel %vm243_vm0, %v571_v58, 2147483647 }
  0x7b   :  { %v598_v61 = vshra.s32 %v2107_v60, 16  ;;  %1694 = vpow2.f32 %v348_v57 }
  0x7c   :  { %1696 = vpow2.f32 %v344_v59 }
  0x7d   :  { %v2110_v62 = vcvt.s32.f32 %v598_v61 }
  0x7e   :  { %v2112_v63 = vpop.xlane.xlu2 %260  ;;  %v2114_v3 = vpop.xlane.xlu1 %254 }
  0x7f   :  { %v324_v2 = vsub.f32 %v1944_v6, %v2112_v63  ;;  %v322_v4 = vsub.f32 %v1949_v7, %v2114_v3  ;;  %601 = vmin.xlane.f32.xlu2 %v2110_v62  ;;  %v2121_v5 = vpop.xlane.xlu0 %248  ;;  %vm551_vm3 = vcmp.eq.f32.partialorder %v1944_v6, %v2112_v63  ;;  %vm549_vm4 = vcmp.eq.f32.partialorder %v1949_v7, %v2114_v3 }
  0x80   :  { %v320_v9 = vsub.f32 %v1954_v8, %v2121_v5  ;;  %vm547_vm5 = vcmp.eq.f32.partialorder %v1954_v8, %v2121_v5 }
  0x81   :  { %v354_v10 = vmul.f32 1.442695, %v324_v2  ;;  %v350_v11 = vmul.f32 1.442695, %v322_v4  ;;  %v1695_v15 = vpop.eup %1694 }
  0x82   :  { %v346_v17 = vmul.f32 1.442695, %v320_v9  ;;  %v1697_v21 = vpop.eup %1696  ;;  %v400_v22 = vsel %vm243_vm0, %v1695_v15, 0.0 }
  0x83   :  { %1698 = vpow2.f32 %v354_v10  ;;  %401 = vadd.xlane.f32.xlu0 %v400_v22  ;;  %v394_v23 = vsel %vm243_vm0, %v1697_v21, 0.0 }
  0x84   :  { %1700 = vpow2.f32 %v350_v11  ;;  %395 = vadd.xlane.f32.xlu1 %v394_v23 }
  0x85   :  { %1702 = vpow2.f32 %v346_v17 }
  0x86   :  { %v2129_v28 = vpop.xlane.xlu2 %269  ;;  %v2131_v29 = vpop.xlane.xlu1 %266  ;;  %1704 = vpow2.f32 %v352_v27 }
  0x87   :  { %v327_v33 = vsub.f32 %v1965_v12, %v2129_v28  ;;  %v2135_v34 = vpop.xlane.xlu0 %263  ;;  %v326_v41 = vsub.f32 %v1970_v13, %v2131_v29  ;;  %vm554_vm6 = vcmp.eq.f32.partialorder %v1965_v12, %v2129_v28  ;;  %v575_v12 = vsel %vm550_vm7, %v2095_v51, 10 }
  0x88   :  { %v325_v35 = vsub.f32 %v1975_v14, %v2135_v34  ;;  %vm552_vm8 = vcmp.eq.f32.partialorder %v1975_v14, %v2135_v34  ;;  %vm553_vm9 = vcmp.eq.f32.partialorder %v1970_v13, %v2131_v29  ;;  %v2284_v34 = vsel %vm243_vm0, %v575_v12, 2147483647 }
  0x89   :  { %v1699_v39 = vpop.eup %1698  ;;  %v360_v40 = vmul.f32 1.442695, %v327_v33  ;;  %v358_v55 = vmul.f32 1.442695, %v326_v41 }
  0x8a   :  { %v1701_v45 = vpop.eup %1700  ;;  %v356_v46 = vmul.f32 1.442695, %v325_v35  ;;  %v409_v47 = vsel %vm243_vm0, %v1699_v39, 0.0 }
  0x8b   :  { %v1703_v49 = vpop.eup %1702  ;;  %1706 = vpow2.f32 %v360_v40  ;;  %v403_v50 = vsel %vm243_vm0, %v1701_v45, 0.0  ;;  %410 = vadd.xlane.f32.xlu0 %v409_v47 }
  0x8c   :  { %1708 = vpow2.f32 %v356_v46  ;;  %v397_v54 = vsel %vm243_vm0, %v1703_v49, 0.0  ;;  %404 = vadd.xlane.f32.xlu1 %v403_v50  ;;  %v1705_v61 = vpop.eup %1704 }
  0x8d   :  { %398 = vadd.xlane.f32.xlu2 %v397_v54  ;;  %1710 = vpow2.f32 %v358_v55  ;;  %v406_v21 = vsel %vm243_vm0, %v1705_v61, 0.0 }
  0x8e   :  { %v2144_v56 = vpop.xlane.xlu2 %278  ;;  %v2146_v57 = vpop.xlane.xlu1 %275 }
  0x8f   :  { %v330_v58 = vsub.f32 %v1986_v18, %v2144_v56  ;;  %v2150_v59 = vpop.xlane.xlu0 %272  ;;  %v329_v10 = vsub.f32 %v1991_v19, %v2146_v57  ;;  %vm557_vm10 = vcmp.eq.f32.partialorder %v1986_v18, %v2144_v56  ;;  %vm556_vm12 = vcmp.eq.f32.partialorder %v1991_v19, %v2146_v57 }
  0x90   :  { %v328_v2 = vsub.f32 %v1996_v20, %v2150_v59  ;;  %vm555_vm11 = vcmp.eq.f32.partialorder %v1996_v20, %v2150_v59  ;;  %v581_v57 = vsel %vm556_vm12, %v2095_v51, 10 }
  0x91   :  { %v1707_v4 = vpop.eup %1706  ;;  %v366_v9 = vmul.f32 1.442695, %v330_v58  ;;  %v364_v22 = vmul.f32 1.442695, %v329_v10 }
  0x92   :  { %v1709_v11 = vpop.eup %1708  ;;  %v362_v15 = vmul.f32 1.442695, %v328_v2  ;;  %v418_v16 = vsel %vm243_vm0, %v1707_v4, 0.0 }
  0x93   :  { %1712 = vpow2.f32 %v366_v9  ;;  %v412_v17 = vsel %vm243_vm0, %v1709_v11, 0.0  ;;  %419 = vadd.xlane.f32.xlu0 %v418_v16  ;;  %v1711_v33 = vpop.eup %1710 }
  0x94   :  { %1714 = vpow2.f32 %v362_v15  ;;  %413 = vadd.xlane.f32.xlu1 %v412_v17  ;;  %v415_v54 = vsel %vm243_vm0, %v1711_v33, 0.0 }
  0x95   :  { %407 = vadd.xlane.f32.xlu2 %v406_v21  ;;  %1716 = vpow2.f32 %v364_v22 }
  0x96   :  { %v2159_v23 = vpop.xlane.xlu2 %287  ;;  %v2161_v27 = vpop.xlane.xlu1 %284 }
  0x97   :  { %v333_v35 = vsub.f32 %v2007_v24, %v2159_v23  ;;  %v2165_v39 = vpop.xlane.xlu0 %281  ;;  %v332_v46 = vsub.f32 %v2012_v25, %v2161_v27  ;;  %vm560_vm13 = vcmp.eq.f32.partialorder %v2007_v24, %v2159_v23  ;;  %vm559_vm15 = vcmp.eq.f32.partialorder %v2012_v25, %v2161_v27 }
  0x98   :  { %v331_v40 = vsub.f32 %v2017_v26, %v2165_v39  ;;  %vm558_vm14 = vcmp.eq.f32.partialorder %v2017_v26, %v2165_v39  ;;  %v584_v27 = vsel %vm559_vm15, %v2095_v51, 10 }
  0x99   :  { %v1713_v41 = vpop.eup %1712  ;;  %v372_v45 = vmul.f32 1.442695, %v333_v35  ;;  %v370_v58 = vmul.f32 1.442695, %v332_v46  ;;  %v583_v24 = vsel %vm558_vm14, %v2095_v51, 10 }
  0x9a   :  { %v1715_v47 = vpop.eup %1714  ;;  %v368_v49 = vmul.f32 1.442695, %v331_v40  ;;  %v427_v50 = vsel %vm243_vm0, %v1713_v41, 0.0  ;;  %v2344_v39 = vsel %vm243_vm0, %v583_v24, 2147483647 }
  0x9b   :  { %1718 = vpow2.f32 %v372_v45  ;;  %v421_v55 = vsel %vm243_vm0, %v1715_v47, 0.0  ;;  %428 = vadd.xlane.f32.xlu0 %v427_v50  ;;  %v1717_v4 = vpop.eup %1716  ;;  %v778_v25 = vshra.s32 %v2344_v39, 16  ;;  %v2363_v12 = vsel %vm243_vm0, %v584_v27, 2147483647 }
  0x9c   :  { %1720 = vpow2.f32 %v368_v49  ;;  %422 = vadd.xlane.f32.xlu1 %v421_v55  ;;  %v424_v35 = vsel %vm243_vm0, %v1717_v4, 0.0 }
  0x9d   :  { %416 = vadd.xlane.f32.xlu2 %v415_v54  ;;  %1722 = vpow2.f32 %v370_v58 }
  0x9e   :  { %v2174_v61 = vpop.xlane.xlu2 %296  ;;  %v2176_v2 = vpop.xlane.xlu1 %293 }
  0x9f   :  { %v336_v9 = vsub.f32 %v2028_v30, %v2174_v61  ;;  %v2180_v10 = vpop.xlane.xlu0 %290  ;;  %v335_v17 = vsub.f32 %v2033_v31, %v2176_v2  ;;  %vm563_vm1 = vcmp.eq.f32.partialorder %v2028_v30, %v2174_v61 }
  0xa0   :  { %v334_v11 = vsub.f32 %v2038_v32, %v2180_v10 }
  0xa1   :  { %v1719_v15 = vpop.eup %1718  ;;  %v378_v16 = vmul.f32 1.442695, %v336_v9  ;;  %v376_v41 = vmul.f32 1.442695, %v335_v17 }
  0xa2   :  { %v1721_v21 = vpop.eup %1720  ;;  %v374_v22 = vmul.f32 1.442695, %v334_v11  ;;  %v436_v33 = vsel %vm243_vm0, %v1719_v15, 0.0 }
  0xa3   :  { %1724 = vpow2.f32 %v378_v16  ;;  %v430_v40 = vsel %vm243_vm0, %v1721_v21, 0.0  ;;  %437 = vadd.xlane.f32.xlu0 %v436_v33  ;;  %v1723_v47 = vpop.eup %1722 }
  0xa4   :  { %1726 = vpow2.f32 %v374_v22  ;;  %431 = vadd.xlane.f32.xlu1 %v430_v40  ;;  %v433_v16 = vsel %vm243_vm0, %v1723_v47, 0.0 }
  0xa5   :  { %425 = vadd.xlane.f32.xlu2 %v424_v35  ;;  %1728 = vpow2.f32 %v376_v41 }
  0xa6   :  { %v2189_v45 = vpop.xlane.xlu2 %305  ;;  %v2191_v46 = vpop.xlane.xlu1 %302 }
  0xa7   :  { %v339_v49 = vsub.f32 %v2049_v36, %v2189_v45  ;;  %v2195_v50 = vpop.xlane.xlu0 %299  ;;  %v338_v4 = vsub.f32 %v2054_v37, %v2191_v46 }
  0xa8   :  { %v337_v54 = vsub.f32 %v2059_v38, %v2195_v50 }
  0xa9   :  { %v1725_v55 = vpop.eup %1724  ;;  %v384_v58 = vmul.f32 1.442695, %v339_v49  ;;  %v382_v21 = vmul.f32 1.442695, %v338_v4 }
  0xaa   :  { %v1727_v9 = vpop.eup %1726  ;;  %v380_v11 = vmul.f32 1.442695, %v337_v54  ;;  %v445_v15 = vsel %vm243_vm0, %v1725_v55, 0.0 }
  0xab   :  { %1730 = vpow2.f32 %v384_v58  ;;  %v439_v17 = vsel %vm243_vm0, %v1727_v9, 0.0  ;;  %446 = vadd.xlane.f32.xlu0 %v445_v15  ;;  %v1729_v35 = vpop.eup %1728 }
  0xac   :  { %1732 = vpow2.f32 %v380_v11  ;;  %440 = vadd.xlane.f32.xlu1 %v439_v17  ;;  %v442_v11 = vsel %vm243_vm0, %v1729_v35, 0.0 }
  0xad   :  { %434 = vadd.xlane.f32.xlu2 %v433_v16  ;;  %1734 = vpow2.f32 %v382_v21 }
  0xae   :  { %v2204_v22 = vpop.xlane.xlu2 %314  ;;  %v2206_v33 = vpop.xlane.xlu1 %311 }
  0xaf   :  { %v342_v40 = vsub.f32 %v2070_v42, %v2204_v22  ;;  %v2210_v41 = vpop.xlane.xlu0 %308  ;;  %v341_v55 = vsub.f32 %v2075_v43, %v2206_v33 }
  0xb0   :  { %v340_v47 = vsub.f32 %v2080_v44, %v2210_v41  ;;  %vm567_vm7 = vcmp.eq.f32.partialorder %v2080_v44, %v2210_v41 }
  0xb1   :  { %v1731_v49 = vpop.eup %1730  ;;  %v390_v54 = vmul.f32 1.442695, %v342_v40  ;;  %v388_v16 = vmul.f32 1.442695, %v341_v55 }
  0xb2   :  { %v1733_v58 = vpop.eup %1732  ;;  %v386_v4 = vmul.f32 1.442695, %v340_v47  ;;  %v454_v9 = vsel %vm243_vm0, %v1731_v49, 0.0  ;;  %v573_v47 = vsel %vm548_vm2, %v2095_v51, 10  ;;  %vm561_vm2 = vcmp.eq.f32.partialorder %v2038_v32, %v2180_v10 }
  0xb3   :  { %1736 = vpow2.f32 %v390_v54  ;;  %v448_v15 = vsel %vm243_vm0, %v1733_v58, 0.0  ;;  %455 = vadd.xlane.f32.xlu0 %v454_v9  ;;  %v1735_v17 = vpop.eup %1734  ;;  %v2230_v53 = vsel %vm243_vm0, %v573_v47, 2147483647  ;;  %v576_v9 = vsel %vm551_vm3, %v2095_v51, 10 }
  0xb4   :  { %1738 = vpow2.f32 %v386_v4  ;;  %449 = vadd.xlane.f32.xlu1 %v448_v15  ;;  %v451_v4 = vsel %vm243_vm0, %v1735_v17, 0.0  ;;  %v572_v15 = vsel %vm547_vm5, %v2095_v51, 10  ;;  %v2247_v7 = vsel %vm243_vm0, %v576_v9, 2147483647 }
  0xb5   :  { %443 = vadd.xlane.f32.xlu2 %v442_v11  ;;  %1740 = vpow2.f32 %v388_v16  ;;  %v574_v11 = vsel %vm549_vm4, %v2095_v51, 10  ;;  %v2254_v3 = vsel %vm243_vm0, %v572_v15, 2147483647  ;;  %v673_v5 = vshra.s32 %v2247_v7, 16 }
  0xb6   :  { %v2251_v8 = vsel %vm243_vm0, %v574_v11, 2147483647  ;;  %v613_v47 = vshra.s32 %v2254_v3, 16  ;;  %v586_v30 = vsel %vm561_vm2, %v2095_v51, 10  ;;  %vm562_vm3 = vcmp.eq.f32.partialorder %v2033_v31, %v2176_v2 }
  0xb7   :  { %v2221_v21 = vpop.xlane.xlu0 %317  ;;  %v2268_v28 = vcvt.s32.f32 %v673_v5  ;;  %v2374_v10 = vsel %vm243_vm0, %v586_v30, 2147483647  ;;  %vm566_vm4 = vcmp.eq.f32.partialorder %v2049_v36, %v2189_v45  ;;  %vm564_vm5 = vcmp.eq.f32.partialorder %v2059_v38, %v2195_v50 }
  0xb8   :  { %3499 = vst [vmem:[#allocation8_spill] sm:$0xff] %v2221_v21  ;;  %v343_v40 = vsub.f32 %v2091_v48, %v2221_v21  ;;  %v628_v48 = vshra.s32 %v2230_v53, 16  ;;  %v2272_v0 = vcvt.s32.f32 %v613_v47  ;;  %v823_v31 = vshra.s32 %v2374_v10, 16 }
  0xb9   :  { %v1737_v35 = vpop.eup %1736  ;;  %v587_v2 = vsel %vm562_vm3, %v2095_v51, 10  ;;  %v589_v36 = vsel %vm564_vm5, %v2095_v51, 10 }
  0xba   :  { %v1739_v49 = vpop.eup %1738  ;;  %v392_v54 = vmul.f32 1.442695, %v343_v40  ;;  %v463_v58 = vsel %vm243_vm0, %v1737_v35, 0.0  ;;  %v2242_v17 = vcvt.s32.f32 %v628_v48  ;;  %v643_v40 = vshra.s32 %v2251_v8, 16 }
  0xbb   :  { %v457_v1 = vsel %vm243_vm0, %v1739_v49, 0.0  ;;  %464 = vadd.xlane.f32.xlu0 %v463_v58  ;;  %v1741_v55 = vpop.eup %1740  ;;  %v579_v35 = vsel %vm554_vm6, %v2095_v51, 10  ;;  %v577_v49 = vsel %vm552_vm8, %v2095_v51, 10  ;;  %v658_v58 = vshra.s32 %v2284_v34, 16 }
  0xbc   :  { %1742 = vpow2.f32 %v392_v54  ;;  %458 = vadd.xlane.f32.xlu1 %v457_v1  ;;  %v460_v6 = vsel %vm243_vm0, %v1741_v55, 0.0  ;;  %v2270_v54 = vcvt.s32.f32 %v643_v40  ;;  %v2275_v14 = vsel %vm243_vm0, %v579_v35, 2147483647 }
  0xbd   :  { %452 = vadd.xlane.f32.xlu2 %v451_v4  ;;  %v2281_v52 = vsel %vm243_vm0, %v577_v49, 2147483647  ;;  %v718_v13 = vshra.s32 %v2275_v14, 16  ;;  %v578_v4 = vsel %vm553_vm9, %v2095_v51, 10  ;;  %v582_v1 = vsel %vm557_vm10, %v2095_v51, 10 }
  0xbe   :  { %v688_v29 = vshra.s32 %v2281_v52, 16  ;;  %v580_v48 = vsel %vm555_vm11, %v2095_v51, 10  ;;  %v2301_v56 = vsel %vm243_vm0, %v578_v4, 2147483647  ;;  %v2305_v20 = vcvt.s32.f32 %v658_v58 }
  0xbf   :  { %v2298_v18 = vcvt.s32.f32 %v718_v13  ;;  %v2308_v59 = vsel %vm243_vm0, %v582_v1, 2147483647  ;;  %v2314_v9 = vsel %vm243_vm0, %v580_v48, 2147483647  ;;  %v703_v11 = vshra.s32 %v2301_v56, 16 }
  0xc0   :  { %v2303_v55 = vcvt.s32.f32 %v688_v29  ;;  %v763_v15 = vshra.s32 %v2308_v59, 16  ;;  %v733_v19 = vshra.s32 %v2314_v9, 16  ;;  %v588_v35 = vsel %vm563_vm1, %v2095_v51, 10 }
  0xc1   :  { %v2365_v13 = vcvt.s32.f32 %v778_v25  ;;  %v2368_v32 = vsel %vm243_vm0, %v588_v35, 2147483647  ;;  %v793_v29 = vshra.s32 %v2363_v12, 16  ;;  %v591_v4 = vsel %vm566_vm4, %v2095_v51, 10 }
  0xc2   :  { %v1743_v16 = vpop.eup %1742  ;;  %v2330_v23 = vcvt.s32.f32 %v763_v15  ;;  %v2335_v5 = vcvt.s32.f32 %v733_v19  ;;  %v853_v58 = vshra.s32 %v2368_v32, 16  ;;  %v2393_v48 = vsel %vm243_vm0, %v587_v2, 2147483647 }
  0xc3   :  { %v466_v63 = vsel %vm243_vm0, %v1743_v16, 0.0  ;;  %631 = vmin.xlane.f32.xlu0 %v2242_v17  ;;  %v585_v16 = vsel %vm560_vm13, %v2095_v51, 10  ;;  %v2387_v1 = vcvt.s32.f32 %v793_v29  ;;  %v2398_v38 = vsel %vm243_vm0, %v591_v4, 2147483647 }
  0xc4   :  { %467 = vadd.xlane.f32.xlu1 %v466_v63  ;;  %v2333_v63 = vsel %vm243_vm0, %v581_v57, 2147483647  ;;  %v2338_v26 = vsel %vm243_vm0, %v585_v16, 2147483647  ;;  %v2390_v45 = vcvt.s32.f32 %v853_v58  ;;  %vm565_vm6 = vcmp.eq.f32.partialorder %v2054_v37, %v2191_v46 }
  0xc5   :  { %461 = vadd.xlane.f32.xlu2 %v460_v6  ;;  %v2327_v6 = vcvt.s32.f32 %v703_v11  ;;  %v748_v40 = vshra.s32 %v2333_v63, 16  ;;  %v808_v47 = vshra.s32 %v2338_v26, 16  ;;  %v2395_v11 = vcvt.s32.f32 %v823_v31 }
  0xc6   :  { %v2404_v50 = vsel %vm243_vm0, %v589_v36, 2147483647  ;;  %v838_v15 = vshra.s32 %v2393_v48, 16  ;;  %v898_v19 = vshra.s32 %v2398_v38, 16  ;;  %v590_v37 = vsel %vm565_vm6, %v2095_v51, 10 }
  0xc7   :  { %v2357_v49 = vcvt.s32.f32 %v748_v40  ;;  %v2360_v61 = vcvt.s32.f32 %v808_v47  ;;  %v868_v57 = vshra.s32 %v2404_v50, 16  ;;  %v592_v16 = vsel %vm567_vm7, %v2095_v51, 10 }
  0xc8   :  { %v2414_v46 = vcvt.s32.f32 %v838_v15  ;;  %v2417_v24 = vcvt.s32.f32 %v898_v19  ;;  %v2420_v40 = vsel %vm243_vm0, %v590_v37, 2147483647  ;;  %v2426_v44 = vsel %vm243_vm0, %v592_v16, 2147483647 }
  0xc9   :  { %v2422_v47 = vcvt.s32.f32 %v868_v57  ;;  %v597_v25 = vand.u32 65535, %v2107_v60  ;;  %v883_v27 = vshra.s32 %v2420_v40, 16  ;;  %v913_v30 = vshra.s32 %v2426_v44, 16 }
  0xcb   :  { %676 = vmin.xlane.f32.xlu0 %v2268_v28  ;;  %v599_v58 = vcvt.s32.f32 %v597_v25  ;;  %v2441_v31 = vcvt.s32.f32 %v883_v27  ;;  %v2443_v4 = vcvt.s32.f32 %v913_v30 }
  0xcc   :  { %616 = vmin.xlane.f32.xlu1 %v2272_v0 }
  0xcd   :  { %646 = vmin.xlane.f32.xlu2 %v2270_v54 }
  0xd3   :  { %721 = vmin.xlane.f32.xlu0 %v2298_v18 }
  0xd4   :  { %661 = vmin.xlane.f32.xlu1 %v2305_v20 }
  0xd5   :  { %691 = vmin.xlane.f32.xlu2 %v2303_v55 }
  0xdb   :  { %766 = vmin.xlane.f32.xlu0 %v2330_v23 }
  0xdc   :  { %706 = vmin.xlane.f32.xlu1 %v2327_v6 }
  0xdd   :  { %736 = vmin.xlane.f32.xlu2 %v2335_v5 }
  0xe3   :  { %811 = vmin.xlane.f32.xlu0 %v2360_v61 }
  0xe4   :  { %751 = vmin.xlane.f32.xlu1 %v2357_v49 }
  0xe5   :  { %781 = vmin.xlane.f32.xlu2 %v2365_v13 }
  0xeb   :  { %856 = vmin.xlane.f32.xlu0 %v2390_v45 }
  0xec   :  { %796 = vmin.xlane.f32.xlu1 %v2387_v1 }
  0xed   :  { %826 = vmin.xlane.f32.xlu2 %v2395_v11 }
  0xf2   :  { %v2428_v41 = vpop.xlane.xlu2 %601 }
  0xf3   :  { %901 = vmin.xlane.f32.xlu0 %v2417_v24  ;;  %3500 = vst [vmem:[#allocation9_spill] sm:$0xff] %v2428_v41  ;;  %vm603_vm8 = vcmp.eq.f32.partialorder %v2110_v62, %v2428_v41 }
  0xf4   :  { %841 = vmin.xlane.f32.xlu1 %v2414_v46  ;;  %v604_v2 = vsel %vm603_vm8, %v599_v58, inf }
  0xf5   :  { %871 = vmin.xlane.f32.xlu2 %v2422_v47 }
  0xf6   :  { %v2434_v35 = vpop.xlane.xlu0 %401 }
  0xf7   :  { %3501 = vst [vmem:[#allocation10_spill] sm:$0xff] %v2434_v35  ;;  %v2437_v29 = vpop.xlane.xlu1 %395 }
  0xf8   :  { %3502 = vst [vmem:[#allocation11_spill] sm:$0xff] %v2437_v29 }
  0xfb   :  { %605 = vmin.xlane.f32.xlu0 %v604_v2 }
  0xfc   :  { %886 = vmin.xlane.f32.xlu1 %v2441_v31 }
  0xfd   :  { %916 = vmin.xlane.f32.xlu2 %v2443_v4 }
  0xfe   :  { %v2447_v60 = vpop.xlane.xlu0 %410 }
  0xff   :  { %v2449_v36 = vpop.xlane.xlu1 %404 }
 0x100   :  { %v2451_v15 = vpop.xlane.xlu2 %398 }
 0x106   :  { %v2453_v19 = vpop.xlane.xlu0 %419 }
 0x107   :  { %v2457_v57 = vpop.xlane.xlu1 %413 }
 0x108   :  { %v2455_v62 = vpop.xlane.xlu2 %407 }
 0x10e   :  { %v2459_v37 = vpop.xlane.xlu0 %428 }
 0x10f   :  { %3503 = vst [vmem:[#allocation12_spill] sm:$0xff] %v2459_v37  ;;  %v2463_v25 = vpop.xlane.xlu1 %422 }
 0x110   :  { %v2461_v16 = vpop.xlane.xlu2 %416  ;;  %3505 = vst [vmem:[#allocation14_spill] sm:$0xff] %v2463_v25 }
 0x111   :  { %3504 = vst [vmem:[#allocation13_spill] sm:$0xff] %v2461_v16 }
 0x116   :  { %v2465_v27 = vpop.xlane.xlu0 %437 }
 0x117   :  { %3506 = vst [vmem:[#allocation15_spill] sm:$0xff] %v2465_v27  ;;  %v2469_v58 = vpop.xlane.xlu1 %431 }
 0x118   :  { %v2467_v30 = vpop.xlane.xlu2 %425  ;;  %3508 = vst [vmem:[#allocation17_spill] sm:$0xff] %v2469_v58 }
 0x119   :  { %3507 = vst [vmem:[#allocation16_spill] sm:$0xff] %v2467_v30  ;;  %v627_v30 = vand.u32 65535, %v2230_v53 }
 0x11e   :  { %v2471_v2 = vpop.xlane.xlu0 %446 }
 0x11f   :  { %3509 = vst [vmem:[#allocation18_spill] sm:$0xff] %v2471_v2  ;;  %v2475_v29 = vpop.xlane.xlu1 %440  ;;  %v629_v2 = vcvt.s32.f32 %v627_v30 }
 0x120   :  { %v2473_v35 = vpop.xlane.xlu2 %434  ;;  %3511 = vst [vmem:[#allocation20_spill] sm:$0xff] %v2475_v29 }
 0x121   :  { %3510 = vst [vmem:[#allocation19_spill] sm:$0xff] %v2473_v35 }
 0x126   :  { %v2477_v41 = vpop.xlane.xlu0 %455 }
 0x127   :  { %3512 = vst [vmem:[#allocation21_spill] sm:$0xff] %v2477_v41  ;;  %v2481_v37 = vpop.xlane.xlu1 %449 }
 0x128   :  { %v2479_v21 = vpop.xlane.xlu2 %443  ;;  %3514 = vst [vmem:[#allocation23_spill] sm:$0xff] %v2481_v37 }
 0x129   :  { %3513 = vst [vmem:[#allocation22_spill] sm:$0xff] %v2479_v21 }
 0x12e   :  { %v2483_v16 = vpop.xlane.xlu0 %464 }
 0x12f   :  { %3515 = vst [vmem:[#allocation24_spill] sm:$0xff] %v2483_v16  ;;  %v2487_v27 = vpop.xlane.xlu1 %458  ;;  %v642_v16 = vand.u32 65535, %v2251_v8 }
 0x130   :  { %v2485_v25 = vpop.xlane.xlu2 %452  ;;  %3517 = vst [vmem:[#allocation26_spill] sm:$0xff] %v2487_v27  ;;  %v672_v27 = vand.u32 65535, %v2247_v7 }
 0x131   :  { %3516 = vst [vmem:[#allocation25_spill] sm:$0xff] %v2485_v25  ;;  %v612_v25 = vand.u32 65535, %v2254_v3  ;;  %v687_v3 = vand.u32 65535, %v2281_v52 }
 0x133   :  { %v614_v37 = vcvt.s32.f32 %v612_v25 }
 0x136   :  { %v2490_v58 = vpop.xlane.xlu0 %631 }
 0x137   :  { %v2494_v29 = vpop.xlane.xlu1 %467  ;;  %vm633_vm9 = vcmp.eq.f32.partialorder %v2242_v17, %v2490_v58 }
 0x138   :  { %v2492_v35 = vpop.xlane.xlu2 %461  ;;  %3519 = vst [vmem:[#allocation28_spill] sm:$0xff] %v2494_v29  ;;  %v634_v41 = vsel %vm633_vm9, %v629_v2, inf  ;;  %v674_v29 = vcvt.s32.f32 %v672_v27  ;;  %v689_v27 = vcvt.s32.f32 %v687_v3  ;;  %v762_v2 = vand.u32 65535, %v2308_v59 }
 0x139   :  { %3518 = vst [vmem:[#allocation27_spill] sm:$0xff] %v2492_v35  ;;  %635 = vmin.xlane.f32.xlu1 %v634_v41  ;;  %v644_v35 = vcvt.s32.f32 %v642_v16  ;;  %v657_v41 = vand.u32 65535, %v2284_v34  ;;  %v717_v16 = vand.u32 65535, %v2275_v14  ;;  %v777_v3 = vand.u32 65535, %v2344_v39 }
 0x13e   :  { %v2501_v21 = vpop.xlane.xlu0 %676 }
 0x13f   :  { %v2505_v30 = vpop.xlane.xlu1 %616  ;;  %vm678_vm10 = vcmp.eq.f32.partialorder %v2268_v28, %v2501_v21 }
 0x140   :  { %v2503_v53 = vpop.xlane.xlu2 %646  ;;  %vm618_vm12 = vcmp.eq.f32.partialorder %v2272_v0, %v2505_v30  ;;  %v679_v8 = vsel %vm678_vm10, %v674_v29, inf  ;;  %v659_v0 = vcvt.s32.f32 %v657_v41  ;;  %v732_v29 = vand.u32 65535, %v2314_v9 }
 0x141   :  { %vm648_vm11 = vcmp.eq.f32.partialorder %v2270_v54, %v2503_v53  ;;  %v619_v7 = vsel %vm618_vm12, %v614_v37, inf  ;;  %680 = vmin.xlane.f32.xlu1 %v679_v8  ;;  %v702_v37 = vand.u32 65535, %v2301_v56  ;;  %v764_v8 = vcvt.s32.f32 %v762_v2 }
 0x142   :  { %v649_v17 = vsel %vm648_vm11, %v644_v35, inf  ;;  %620 = vmin.xlane.f32.xlu2 %v619_v7  ;;  %v719_v35 = vcvt.s32.f32 %v717_v16  ;;  %v734_v7 = vcvt.s32.f32 %v732_v29  ;;  %v747_v41 = vand.u32 65535, %v2333_v63 }
 0x143   :  { %650 = vmin.xlane.f32.xlu0 %v649_v17  ;;  %v807_v16 = vand.u32 65535, %v2338_v26  ;;  %vm568_vm10 = vcmp.eq.f32.partialorder %v2075_v43, %v2206_v33 }
 0x146   :  { %v2516_v25 = vpop.xlane.xlu0 %721 }
 0x147   :  { %v2520_v54 = vpop.xlane.xlu1 %661  ;;  %vm723_vm13 = vcmp.eq.f32.partialorder %v2298_v18, %v2516_v25 }
 0x148   :  { %v2518_v28 = vpop.xlane.xlu2 %691  ;;  %vm663_vm15 = vcmp.eq.f32.partialorder %v2305_v20, %v2520_v54  ;;  %v724_v34 = vsel %vm723_vm13, %v719_v35, inf  ;;  %v704_v20 = vcvt.s32.f32 %v702_v37  ;;  %v809_v35 = vcvt.s32.f32 %v807_v16 }
 0x149   :  { %vm693_vm14 = vcmp.eq.f32.partialorder %v2303_v55, %v2518_v28  ;;  %v664_v14 = vsel %vm663_vm15, %v659_v0, inf  ;;  %725 = vmin.xlane.f32.xlu1 %v724_v34  ;;  %v779_v0 = vcvt.s32.f32 %v777_v3  ;;  %v852_v34 = vand.u32 65535, %v2368_v32 }
 0x14a   :  { %v694_v52 = vsel %vm693_vm14, %v689_v27, inf  ;;  %665 = vmin.xlane.f32.xlu2 %v664_v14  ;;  %v792_v14 = vand.u32 65535, %v2363_v12  ;;  %vm569_vm14 = vcmp.eq.f32.partialorder %v2070_v42, %v2204_v22  ;;  %v882_v3 = vand.u32 65535, %v2420_v40 }
 0x14b   :  { %695 = vmin.xlane.f32.xlu0 %v694_v52  ;;  %v822_v52 = vand.u32 65535, %v2374_v10  ;;  %v854_v2 = vcvt.s32.f32 %v852_v34  ;;  %v653_v34 = vcvt.f32.s32 %v2503_v53 }
 0x14d   :  { %v824_v37 = vcvt.s32.f32 %v822_v52 }
 0x14e   :  { %v2531_v17 = vpop.xlane.xlu0 %766 }
 0x14f   :  { %v2535_v55 = vpop.xlane.xlu1 %706  ;;  %vm768_vm1 = vcmp.eq.f32.partialorder %v2330_v23, %v2531_v17 }
 0x150   :  { %v2533_v18 = vpop.xlane.xlu2 %736  ;;  %vm708_vm3 = vcmp.eq.f32.partialorder %v2327_v6, %v2535_v55  ;;  %v769_v9 = vsel %vm768_vm1, %v764_v8, inf  ;;  %v749_v6 = vcvt.s32.f32 %v747_v41  ;;  %v837_v8 = vand.u32 65535, %v2393_v48 }
 0x151   :  { %vm738_vm2 = vcmp.eq.f32.partialorder %v2335_v5, %v2533_v18  ;;  %v709_v59 = vsel %vm708_vm3, %v704_v20, inf  ;;  %770 = vmin.xlane.f32.xlu1 %v769_v9  ;;  %v867_v20 = vand.u32 65535, %v2404_v50  ;;  %vm470_vm3 = vcmp.lt.f32.partialorder %v2451_v15, 6.6666665 }
 0x152   :  { %v739_v56 = vsel %vm738_vm2, %v734_v7, inf  ;;  %710 = vmin.xlane.f32.xlu2 %v709_v59  ;;  %v897_v7 = vand.u32 65535, %v2398_v38  ;;  %v839_v9 = vcvt.s32.f32 %v837_v8  ;;  %v593_v38 = vsel %vm568_vm10, %v2095_v51, 10 }
 0x153   :  { %740 = vmin.xlane.f32.xlu0 %v739_v56  ;;  %v869_v59 = vcvt.s32.f32 %v867_v20  ;;  %v2592_v50 = vsel %vm243_vm0, %v593_v38, 2147483647  ;;  %vm472_vm2 = vcmp.lt.f32.partialorder %v2449_v36, 6.6666665  ;;  %v3447_v38 = vmov 0.0  }
 0x154   :  { %v522_v53 = vsel %vm472_vm2, 1.0, %v3447_v38  ;;  %v698_v36 = vcvt.f32.s32 %v2518_v28  ;;  %vm477_vm10 = vcmp.lt.f32.partialorder %v2453_v19, 6.6666665 }
 0x156   :  { %v2546_v27 = vpop.xlane.xlu0 %811 }
 0x157   :  { %v2550_v5 = vpop.xlane.xlu1 %751  ;;  %vm813_vm4 = vcmp.eq.f32.partialorder %v2360_v61, %v2546_v27 }
 0x158   :  { %v2548_v23 = vpop.xlane.xlu2 %781  ;;  %vm753_vm6 = vcmp.eq.f32.partialorder %v2357_v49, %v2550_v5  ;;  %v814_v39 = vsel %vm813_vm4, %v809_v35, inf  ;;  %v794_v49 = vcvt.s32.f32 %v792_v14  ;;  %vm474_vm4 = vcmp.lt.f32.partialorder %v2447_v60, 6.6666665 }
 0x159   :  { %vm783_vm5 = vcmp.eq.f32.partialorder %v2365_v13, %v2548_v23  ;;  %v754_v26 = vsel %vm753_vm6, %v749_v6, inf  ;;  %815 = vmin.xlane.f32.xlu1 %v814_v39  ;;  %v884_v6 = vcvt.s32.f32 %v882_v3  ;;  %v520_v60 = vsel %vm470_vm3, 1.0, %v3447_v38 }
 0x15a   :  { %v784_v63 = vsel %vm783_vm5, %v779_v0, inf  ;;  %755 = vmin.xlane.f32.xlu2 %v754_v26  ;;  %v524_v15 = vsel %vm474_vm4, 1.0, %v3447_v38 }
 0x15b   :  { %785 = vmin.xlane.f32.xlu0 %v784_v63 }
 0x15e   :  { %v2561_v29 = vpop.xlane.xlu0 %856 }
 0x15f   :  { %v2565_v13 = vpop.xlane.xlu1 %796  ;;  %vm858_vm7 = vcmp.eq.f32.partialorder %v2390_v45, %v2561_v29 }
 0x160   :  { %v2563_v61 = vpop.xlane.xlu2 %826  ;;  %vm798_vm9 = vcmp.eq.f32.partialorder %v2387_v1, %v2565_v13  ;;  %v859_v10 = vsel %vm858_vm7, %v854_v2, inf }
 0x161   :  { %vm828_vm8 = vcmp.eq.f32.partialorder %v2395_v11, %v2563_v61  ;;  %v799_v32 = vsel %vm798_vm9, %v794_v49, inf  ;;  %860 = vmin.xlane.f32.xlu1 %v859_v10  ;;  %v899_v11 = vcvt.s32.f32 %v897_v7  ;;  %v683_v49 = vcvt.f32.s32 %v2501_v21 }
 0x162   :  { %v829_v12 = vsel %vm828_vm8, %v824_v37, inf  ;;  %800 = vmin.xlane.f32.xlu2 %v799_v32  ;;  %v623_v37 = vcvt.f32.s32 %v2505_v30  ;;  %v654_v32 = vshll.u32 %v653_v34, 16  ;;  %v668_v30 = vcvt.f32.s32 %v2520_v54 }
 0x163   :  { %830 = vmin.xlane.f32.xlu0 %v829_v12  ;;  %v684_v8 = vshll.u32 %v683_v49, 16  ;;  %vm475_vm8 = vcmp.lt.f32.partialorder %v2457_v57, 6.6666665  ;;  %vm473_vm9 = vcmp.lt.f32.partialorder %v2455_v62, 6.6666665  ;;  %v743_v34 = vcvt.f32.s32 %v2533_v18 }
 0x164   :  { %v624_v10 = vshll.u32 %v623_v37, 16  ;;  %v525_v57 = vsel %vm475_vm8, 1.0, %v3447_v38  ;;  %v713_v37 = vcvt.f32.s32 %v2535_v55  ;;  %v773_v49 = vcvt.f32.s32 %v2531_v17 }
 0x165   :  { %v523_v19 = vsel %vm473_vm9, 1.0, %v3447_v38  ;;  %v527_v18 = vsel %vm477_vm10, 1.0, %v3447_v38 }
 0x166   :  { %v2578_v45 = vpop.xlane.xlu0 %901 }
 0x167   :  { %v2582_v1 = vpop.xlane.xlu1 %841  ;;  %vm903_vm11 = vcmp.eq.f32.partialorder %v2417_v24, %v2578_v45  ;;  %v912_v24 = vand.u32 65535, %v2426_v44 }
 0x168   :  { %v2580_v56 = vpop.xlane.xlu2 %871  ;;  %vm843_vm13 = vcmp.eq.f32.partialorder %v2414_v46, %v2582_v1  ;;  %v904_v48 = vsel %vm903_vm11, %v899_v11, inf  ;;  %v594_v46 = vsel %vm569_vm14, %v2095_v51, 10 }
 0x169   :  { %vm873_vm12 = vcmp.eq.f32.partialorder %v2422_v47, %v2580_v56  ;;  %v844_v33 = vsel %vm843_vm13, %v839_v9, inf  ;;  %905 = vmin.xlane.f32.xlu1 %v904_v48  ;;  %v928_v47 = vshra.s32 %v2592_v50, 16  ;;  %v914_v0 = vcvt.s32.f32 %v912_v24 }
 0x16a   :  { %v874_v43 = vsel %vm873_vm12, %v869_v59, inf  ;;  %845 = vmin.xlane.f32.xlu2 %v844_v33  ;;  %v2611_v40 = vsel %vm243_vm0, %v594_v46, 2147483647  ;;  %v699_v46 = vshll.u32 %v698_v36, 16 }
 0x16b   :  { %875 = vmin.xlane.f32.xlu0 %v874_v43  ;;  %v2608_v44 = vcvt.s32.f32 %v928_v47  ;;  %v943_v35 = vshra.s32 %v2611_v40, 16  ;;  %v728_v43 = vcvt.f32.s32 %v2516_v25 }
 0x16d   :  { %v2615_v63 = vcvt.s32.f32 %v943_v35  ;;  %v729_v35 = vshll.u32 %v728_v43, 16  ;;  %v3525_v43 = vld [vmem:[#allocation13_spill] sm:$0xff] }
 0x16e   :  { %v2619_v39 = vpop.xlane.xlu0 %605 }
 0x16f   :  { %v2602_v16 = vpop.xlane.xlu1 %886 }
 0x170   :  { %v2600_v41 = vpop.xlane.xlu2 %916  ;;  %vm888_vm1 = vcmp.eq.f32.partialorder %v2441_v31, %v2602_v16 }
 0x171   :  { %vm918_vm15 = vcmp.eq.f32.partialorder %v2443_v4, %v2600_v41  ;;  %v889_v22 = vsel %vm888_vm1, %v884_v6, inf  ;;  %931 = vmin.xlane.f32.xlu1 %v2608_v44  ;;  %v638_v4 = vcvt.f32.s32 %v2490_v58 }
 0x172   :  { %v919_v42 = vsel %vm918_vm15, %v914_v0, inf  ;;  %890 = vmin.xlane.f32.xlu2 %v889_v22  ;;  %v669_v0 = vshll.u32 %v668_v30, 16  ;;  %vm476_vm15 = vcmp.lt.f32.partialorder %v3525_v43, 6.6666665 }
 0x173   :  { %920 = vmin.xlane.f32.xlu0 %v919_v42  ;;  %v639_v26 = vshll.u32 %v638_v4, 16 }
 0x17b   :  { %946 = vmin.xlane.f32.xlu0 %v2615_v63 }
 0x1ac   :  { %v636_v31 = vpop.xlane.xlu1 %635 }
 0x1ad   :  { %v637_v52 = vcvt.f32.s32 %v636_v31 }
 0x1af   :  { %v2621_v14 = vadd.s32 %v639_v26, %v637_v52 }
 0x1b4   :  { %v681_v7 = vpop.xlane.xlu1 %680 }
 0x1b5   :  { %v621_v2 = vpop.xlane.xlu2 %620  ;;  %v682_v11 = vcvt.f32.s32 %v681_v7 }
 0x1b6   :  { %v651_v12 = vpop.xlane.xlu0 %650  ;;  %v622_v58 = vcvt.f32.s32 %v621_v2 }
 0x1b7   :  { %v652_v20 = vcvt.f32.s32 %v651_v12  ;;  %v685_v21 = vadd.s32 %v684_v8, %v682_v11  ;;  %v714_v8 = vshll.u32 %v713_v37, 16 }
 0x1b8   :  { %v625_v59 = vadd.s32 %v624_v10, %v622_v58 }
 0x1b9   :  { %v655_v9 = vadd.s32 %v654_v32, %v652_v20  ;;  %vm976_vm7 = vcmp.eq.s32.totalorder %v2095_v51, %v685_v21  ;;  %v3523_v32 = vld [vmem:[#allocation14_spill] sm:$0xff]  ;;  %v744_v20 = vshll.u32 %v743_v34, 16 }
 0x1ba   :  { %vm972_vm6 = vcmp.eq.s32.totalorder %v2095_v51, %v625_v59  ;;  %v2648_v54 = vsel %vm976_vm7, 1.0, %v3447_v38  ;;  %vm478_vm14 = vcmp.lt.f32.partialorder %v3523_v32, 6.6666665 }
 0x1bb   :  { %vm974_vm5 = vcmp.eq.s32.totalorder %v2095_v51, %v655_v9  ;;  %v2639_v48 = vsel %vm972_vm6, 1.0, %v3447_v38  ;;  %3520 = vst [vmem:[#allocation29_spill] sm:$0xff] %v2648_v54  ;;  %v2655_v47 = vmul.f32 %v2648_v54, %v524_v15  ;;  %v3526_v15 = vld [vmem:[#allocation12_spill] sm:$0xff] }
 0x1bc   :  { %v2636_v33 = vsel %vm974_vm5, 1.0, %v3447_v38  ;;  %v2652_v3 = vmul.f32 %v2639_v48, %v520_v60  ;;  %v726_v42 = vpop.xlane.xlu1 %725  ;;  %v528_v60 = vsel %vm478_vm14, 1.0, %v3447_v38  ;;  %vm480_vm1 = vcmp.lt.f32.partialorder %v3526_v15, 6.6666665  ;;  %v3533_v15 = vld [vmem:[#allocation20_spill] sm:$0xff] }
 0x1bd   :  { %v2645_v28 = vmul.f32 %v2636_v33, %v522_v53  ;;  %v666_v25 = vpop.xlane.xlu2 %665  ;;  %v727_v4 = vcvt.f32.s32 %v726_v42  ;;  %v774_v53 = vshll.u32 %v773_v49, 16 }
 0x1be   :  { %v696_v24 = vpop.xlane.xlu0 %695  ;;  %3521 = vst [vmem:[#allocation30_spill] sm:$0xff] %v2652_v3  ;;  %v667_v6 = vcvt.f32.s32 %v666_v25 }
 0x1bf   :  { %v697_v22 = vcvt.f32.s32 %v696_v24  ;;  %v730_v52 = vadd.s32 %v729_v35, %v727_v4  ;;  %v788_v24 = vcvt.f32.s32 %v2548_v23  ;;  %v530_v23 = vsel %vm480_vm1, 1.0, %v3447_v38  ;;  %v3528_v4 = vld [vmem:[#allocation17_spill] sm:$0xff] }
 0x1c0   :  { %v670_v31 = vadd.s32 %v669_v0, %v667_v6  ;;  %v818_v0 = vcvt.f32.s32 %v2546_v27  ;;  %vm481_vm5 = vcmp.lt.f32.partialorder %v3528_v4, 6.6666665 }
 0x1c1   :  { %v700_v26 = vadd.s32 %v699_v46, %v697_v22  ;;  %vm979_vm13 = vcmp.eq.s32.totalorder %v2095_v51, %v730_v52  ;;  %v758_v46 = vcvt.f32.s32 %v2550_v5  ;;  %v526_v22 = vsel %vm476_vm15, 1.0, %v3447_v38 }
 0x1c2   :  { %vm975_vm12 = vcmp.eq.s32.totalorder %v2095_v51, %v670_v31  ;;  %v2678_v12 = vsel %vm979_vm13, 1.0, %v3447_v38  ;;  %v789_v52 = vshll.u32 %v788_v24, 16 }
 0x1c3   :  { %vm977_vm11 = vcmp.eq.s32.totalorder %v2095_v51, %v700_v26  ;;  %v2670_v62 = vsel %vm975_vm12, 1.0, %v3447_v38  ;;  %3522 = vst [vmem:[#allocation31_spill] sm:$0xff] %v2678_v12  ;;  %v2685_v7 = vmul.f32 %v2678_v12, %v527_v18  ;;  %v759_v34 = vshll.u32 %v758_v46, 16 }
 0x1c4   :  { %v2667_v2 = vsel %vm977_vm11, 1.0, %v3447_v38  ;;  %v2682_v58 = vmul.f32 %v2670_v62, %v523_v19  ;;  %v771_v59 = vpop.xlane.xlu1 %770  ;;  %v819_v18 = vshll.u32 %v818_v0, 16  ;;  %vm484_vm11 = vcmp.lt.f32.partialorder %v3533_v15, 6.6666665 }
 0x1c5   :  { %v2675_v55 = vmul.f32 %v2667_v2, %v525_v57  ;;  %v711_v17 = vpop.xlane.xlu2 %710  ;;  %v772_v21 = vcvt.f32.s32 %v771_v59 }
 0x1c6   :  { %v741_v10 = vpop.xlane.xlu0 %740  ;;  %3524 = vst [vmem:[#allocation14_spill] sm:$0xff] %v2682_v58  ;;  %v712_v11 = vcvt.f32.s32 %v711_v17 }
 0x1c7   :  { %v742_v9 = vcvt.f32.s32 %v741_v10  ;;  %v775_v25 = vadd.s32 %v774_v53, %v772_v21  ;;  %v803_v53 = vcvt.f32.s32 %v2565_v13  ;;  %v863_v21 = vcvt.f32.s32 %v2561_v29 }
 0x1c8   :  { %v715_v36 = vadd.s32 %v714_v8, %v712_v11  ;;  %v531_v8 = vsel %vm481_vm5, 1.0, %v3447_v38  ;;  %v3530_v11 = vld [vmem:[#allocation15_spill] sm:$0xff] }
 0x1c9   :  { %v745_v30 = vadd.s32 %v744_v20, %v742_v9  ;;  %vm982_vm4 = vcmp.eq.s32.totalorder %v2095_v51, %v775_v25  ;;  %v3529_v20 = vld [vmem:[#allocation16_spill] sm:$0xff]  ;;  %vm483_vm7 = vcmp.lt.f32.partialorder %v3530_v11, 6.6666665  ;;  %v833_v9 = vcvt.f32.s32 %v2563_v61 }
 0x1ca   :  { %vm978_vm2 = vcmp.eq.s32.totalorder %v2095_v51, %v715_v36  ;;  %v2705_v5 = vsel %vm982_vm4, 1.0, %v3447_v38  ;;  %vm479_vm6 = vcmp.lt.f32.partialorder %v3529_v20, 6.6666665  ;;  %v533_v61 = vsel %vm483_vm7, 1.0, %v3447_v38 }
 0x1cb   :  { %vm980_vm3 = vcmp.eq.s32.totalorder %v2095_v51, %v745_v30  ;;  %v2700_v42 = vsel %vm978_vm2, 1.0, %v3447_v38  ;;  %3527 = vst [vmem:[#allocation13_spill] sm:$0xff] %v2705_v5  ;;  %v2712_v26 = vmul.f32 %v2705_v5, %v530_v23  ;;  %v529_v43 = vsel %vm479_vm6, 1.0, %v3447_v38 }
 0x1cc   :  { %v2697_v6 = vsel %vm980_vm3, 1.0, %v3447_v38  ;;  %v2715_v57 = vmul.f32 %v2700_v42, %v526_v22  ;;  %v816_v49 = vpop.xlane.xlu1 %815  ;;  %v834_v0 = vshll.u32 %v833_v9, 16  ;;  %v804_v22 = vshll.u32 %v803_v53, 16  ;;  %v3538_v53 = vld [vmem:[#allocation8_spill] sm:$0xff] }
 0x1cd   :  { %v2708_v35 = vmul.f32 %v2697_v6, %v528_v60  ;;  %v756_v27 = vpop.xlane.xlu2 %755  ;;  %v817_v32 = vcvt.f32.s32 %v816_v49  ;;  %v3534_v49 = vld [vmem:[#allocation19_spill] sm:$0xff]  ;;  %v908_v20 = vcvt.f32.s32 %v2578_v45 }
 0x1ce   :  { %v786_v31 = vpop.xlane.xlu0 %785  ;;  %v757_v37 = vcvt.f32.s32 %v756_v27  ;;  %vm482_vm12 = vcmp.lt.f32.partialorder %v3534_v49, 6.6666665  ;;  %v1844_v45 = vld [vmem:[%s3441_s0 + $0xc0] sm:$0xff]  ;;  %v3540_v49 = vld [vmem:[#allocation22_spill] sm:$0xff] }
 0x1cf   :  { %v787_v19 = vcvt.f32.s32 %v786_v31  ;;  %v820_v59 = vadd.s32 %v819_v18, %v817_v32  ;;  %v864_v31 = vshll.u32 %v863_v21, 16  ;;  %v3535_v18 = vld [vmem:[#allocation18_spill] sm:$0xff]  ;;  %vm570_vm2 = vcmp.eq.f32.partialorder %v1844_v45, %v3538_v53 }
 0x1d0   :  { %v760_v17 = vadd.s32 %v759_v34, %v757_v37  ;;  %vm486_vm13 = vcmp.lt.f32.partialorder %v3535_v18, 6.6666665  ;;  %vm485_vm4 = vcmp.lt.f32.partialorder %v3540_v49, 6.6666665 }
 0x1d1   :  { %v790_v10 = vadd.s32 %v789_v52, %v787_v19  ;;  %vm985_vm10 = vcmp.eq.s32.totalorder %v2095_v51, %v820_v59  ;;  %v534_v19 = vsel %vm484_vm11, 1.0, %v3447_v38  ;;  %v532_v59 = vsel %vm482_vm12, 1.0, %v3447_v38 }
 0x1d2   :  { %vm981_vm8 = vcmp.eq.s32.totalorder %v2095_v51, %v760_v17  ;;  %v2735_v13 = vsel %vm985_vm10, 1.0, %v3447_v38  ;;  %v878_v17 = vcvt.f32.s32 %v2580_v56  ;;  %v536_v56 = vsel %vm486_vm13, 1.0, %v3447_v38 }
 0x1d3   :  { %vm983_vm9 = vcmp.eq.s32.totalorder %v2095_v51, %v790_v10  ;;  %v2730_v30 = vsel %vm981_vm8, 1.0, %v3447_v38  ;;  %3532 = vst [vmem:[#allocation17_spill] sm:$0xff] %v2735_v13  ;;  %v2742_v24 = vmul.f32 %v2735_v13, %v533_v61  ;;  %v848_v10 = vcvt.f32.s32 %v2582_v1  ;;  %v3556_v13 = vld [vmem:[#allocation24_spill] sm:$0xff] }
 0x1d4   :  { %v2727_v36 = vsel %vm983_vm9, 1.0, %v3447_v38  ;;  %3531 = vst [vmem:[#allocation12_spill] sm:$0xff] %v2730_v30  ;;  %v2745_v46 = vmul.f32 %v2730_v30, %v529_v43  ;;  %v861_v4 = vpop.xlane.xlu1 %860  ;;  %v3551_v30 = vld [vmem:[#allocation27_spill] sm:$0xff] }
 0x1d5   :  { %v2738_v60 = vmul.f32 %v2727_v36, %v531_v8  ;;  %v801_v29 = vpop.xlane.xlu2 %800  ;;  %v862_v52 = vcvt.f32.s32 %v861_v4  ;;  %v909_v4 = vshll.u32 %v908_v20, 16 }
 0x1d6   :  { %v831_v25 = vpop.xlane.xlu0 %830  ;;  %v802_v23 = vcvt.f32.s32 %v801_v29  ;;  %v879_v29 = vshll.u32 %v878_v17, 16  ;;  %v923_v17 = vcvt.f32.s32 %v2600_v41 }
 0x1d7   :  { %v832_v27 = vcvt.f32.s32 %v831_v25  ;;  %v865_v32 = vadd.s32 %v864_v31, %v862_v52  ;;  %v849_v25 = vshll.u32 %v848_v10, 16  ;;  %v3539_v31 = vld [vmem:[#allocation23_spill] sm:$0xff]  ;;  %v893_v10 = vcvt.f32.s32 %v2602_v16 }
 0x1d8   :  { %v805_v34 = vadd.s32 %v804_v22, %v802_v23  ;;  %vm487_vm3 = vcmp.lt.f32.partialorder %v3539_v31, 6.6666665 }
 0x1d9   :  { %v835_v37 = vadd.s32 %v834_v0, %v832_v27  ;;  %vm988_vm1 = vcmp.eq.s32.totalorder %v2095_v51, %v865_v32  ;;  %v927_v32 = vand.u32 65535, %v2592_v50  ;;  %v537_v20 = vsel %vm487_vm3, 1.0, %v3447_v38 }
 0x1da   :  { %vm984_vm14 = vcmp.eq.s32.totalorder %v2095_v51, %v805_v34  ;;  %v2768_v9 = vsel %vm988_vm1, 1.0, %v3447_v38  ;;  %v535_v50 = vsel %vm485_vm4, 1.0, %v3447_v38  ;;  %vm492_vm3 = vcmp.lt.f32.partialorder %v3556_v13, 6.6666665 }
 0x1db   :  { %vm986_vm15 = vcmp.eq.s32.totalorder %v2095_v51, %v835_v37  ;;  %v2760_v11 = vsel %vm984_vm14, 1.0, %v3447_v38  ;;  %3537 = vst [vmem:[#allocation15_spill] sm:$0xff] %v2768_v9  ;;  %v2775_v61 = vmul.f32 %v2768_v9, %v536_v56  ;;  %v595_v37 = vsel %vm570_vm2, %v2095_v51, 10 }
 0x1dc   :  { %v2757_v8 = vsel %vm986_vm15, 1.0, %v3447_v38  ;;  %3536 = vst [vmem:[#allocation16_spill] sm:$0xff] %v2760_v11  ;;  %v2778_v15 = vmul.f32 %v2760_v11, %v532_v59  ;;  %v906_v22 = vpop.xlane.xlu1 %905  ;;  %v2816_v31 = vsel %vm243_vm0, %v595_v37, 2147483647  ;;  %vm491_vm15 = vcmp.lt.f32.partialorder %v3551_v30, 6.6666665 }
 0x1dd   :  { %v2765_v1 = vmul.f32 %v2757_v8, %v534_v19  ;;  %v846_v21 = vpop.xlane.xlu2 %845  ;;  %v907_v27 = vcvt.f32.s32 %v906_v22  ;;  %v3541_v19 = vld [vmem:[#allocation21_spill] sm:$0xff]  ;;  %v894_v22 = vshll.u32 %v893_v10, 16  ;;  %v957_v54 = vand.u32 65535, %v2816_v31 }
 0x1de   :  { %v876_v43 = vpop.xlane.xlu0 %875  ;;  %v847_v0 = vcvt.f32.s32 %v846_v21  ;;  %vm489_vm5 = vcmp.lt.f32.partialorder %v3541_v19, 6.6666665 }
 0x1df   :  { %v877_v23 = vcvt.f32.s32 %v876_v43  ;;  %v910_v18 = vadd.s32 %v909_v4, %v907_v27  ;;  %v539_v41 = vsel %vm489_vm5, 1.0, %v3447_v38  ;;  %v929_v43 = vcvt.s32.f32 %v927_v32 }
 0x1e0   :  { %v850_v52 = vadd.s32 %v849_v25, %v847_v0  ;;  %v924_v0 = vshll.u32 %v923_v17, 16  ;;  %v942_v32 = vand.u32 65535, %v2611_v40 }
 0x1e1   :  { %v880_v34 = vadd.s32 %v879_v29, %v877_v23  ;;  %vm991_vm8 = vcmp.eq.s32.totalorder %v2095_v51, %v910_v18  ;;  %v3546_v18 = vld [vmem:[#allocation25_spill] sm:$0xff] }
 0x1e2   :  { %vm987_vm6 = vcmp.eq.s32.totalorder %v2095_v51, %v850_v52  ;;  %v2803_v45 = vsel %vm991_vm8, 1.0, %v3447_v38  ;;  %v3545_v52 = vld [vmem:[#allocation26_spill] sm:$0xff]  ;;  %vm488_vm11 = vcmp.lt.f32.partialorder %v3546_v18, 6.6666665 }
 0x1e3   :  { %vm989_vm7 = vcmp.eq.s32.totalorder %v2095_v51, %v880_v34  ;;  %v2795_v56 = vsel %vm987_vm6, 1.0, %v3447_v38  ;;  %3544 = vst [vmem:[#allocation18_spill] sm:$0xff] %v2803_v45  ;;  %v2806_v29 = vmul.f32 %v2803_v45, %v539_v41  ;;  %vm490_vm10 = vcmp.lt.f32.partialorder %v3545_v52, 6.6666665 }
 0x1e4   :  { %v2792_v59 = vsel %vm989_vm7, 1.0, %v3447_v38  ;;  %3543 = vst [vmem:[#allocation19_spill] sm:$0xff] %v2795_v56  ;;  %v2809_v25 = vmul.f32 %v2795_v56, %v535_v50  ;;  %v2811_v4 = vpop.xlane.xlu1 %931  ;;  %v540_v17 = vsel %vm490_vm10, 1.0, %v3447_v38  ;;  %v944_v41 = vcvt.s32.f32 %v942_v32  ;;  %v2883_v32 = vld [vmem:[%s3442_s1 + $0x38] sm:$0xff] }
 0x1e5   :  { %3542 = vst [vmem:[#allocation20_spill] sm:$0xff] %v2792_v59  ;;  %v2800_v16 = vmul.f32 %v2792_v59, %v537_v20  ;;  %v891_v53 = vpop.xlane.xlu2 %890  ;;  %vm933_vm9 = vcmp.eq.f32.partialorder %v2608_v44, %v2811_v4  ;;  %v958_v44 = vshra.s32 %v2816_v31, 16  ;;  %v538_v20 = vsel %vm488_vm11, 1.0, %v3447_v38 }
 0x1e6   :  { %v921_v21 = vpop.xlane.xlu0 %920  ;;  %v892_v23 = vcvt.f32.s32 %v891_v53  ;;  %v934_v19 = vsel %vm933_vm9, %v929_v43, inf  ;;  %v959_v31 = vcvt.s32.f32 %v957_v54  ;;  %v2980_v54 = vld [vmem:[%s3442_s1 + $0x10] sm:$0xff]  ;;  %vm973_vm7 = vcmp.eq.s32.totalorder %v2095_v51, %v2621_v14 }
 0x1e7   :  { %v922_v27 = vcvt.f32.s32 %v921_v21  ;;  %935 = vmin.xlane.f32.xlu2 %v934_v19  ;;  %v2842_v21 = vcvt.s32.f32 %v958_v44  ;;  %v2876_v19 = vld [vmem:[%s3442_s1 + $0x30] sm:$0xff]  ;;  %v2890_v44 = vld [vmem:[%s3442_s1 + $0x48] sm:$0xff]  ;;  %3560 = vst [vmem:[#allocation34_spill] sm:$0xff] %v2980_v54  ;;  %v1497_v14 = vsel %vm243_vm0, %v2652_v3, 0.0  ;;  %vm1551_vm11 = vcmask 73728  }
 0x1e8   :  { %v895_v34 = vadd.s32 %v894_v22, %v892_v23  ;;  %v2855_v23 = vld [vmem:[%s3442_s1 + $0x8] sm:$0xff]  ;;  %v1064_v18 = vsel %vm243_vm0, %v2876_v19, -inf }
 0x1e9   :  { %v925_v49 = vadd.s32 %v924_v0, %v922_v27  ;;  %v2848_v0 = vld [vmem:[%s3442_s1] sm:$0xff]  ;;  %v2862_v27 = vld [vmem:[%s3442_s1 + $0x18] sm:$0xff] }
 0x1ea   :  { %vm990_vm12 = vcmp.eq.s32.totalorder %v2095_v51, %v895_v34  ;;  %v1046_v22 = vsel %vm243_vm0, %v2848_v0, -inf  ;;  %v1055_v52 = vsel %vm243_vm0, %v2862_v27, -inf  ;;  %v2869_v34 = vld [vmem:[%s3442_s1 + $0x20] sm:$0xff] }
 0x1eb   :  { %vm992_vm13 = vcmp.eq.s32.totalorder %v2095_v51, %v925_v49  ;;  %v2829_v10 = vsel %vm990_vm12, 1.0, %v3447_v38  ;;  %v1058_v49 = vsel %vm243_vm0, %v2869_v34, -inf }
 0x1ec   :  { %v2826_v37 = vsel %vm992_vm13, 1.0, %v3447_v38  ;;  %3548 = vst [vmem:[#allocation23_spill] sm:$0xff] %v2829_v10  ;;  %v2838_v53 = vmul.f32 %v2829_v10, %v538_v20  ;;  %v1073_v20 = vsel %vm243_vm0, %v2890_v44, -inf }
 0x1ed   :  { %3547 = vst [vmem:[#allocation8_spill] sm:$0xff] %v2826_v37  ;;  %v2833_v50 = vmul.f32 %v2826_v37, %v540_v17  ;;  %v1067_v17 = vsel %vm243_vm0, %v2883_v32, -inf }
 0x1ee   :  { %v2835_v40 = vpop.xlane.xlu0 %946  ;;  %3550 = vst [vmem:[#allocation21_spill] sm:$0xff] %v2838_v53 }
 0x1ef   :  { %3549 = vst [vmem:[#allocation22_spill] sm:$0xff] %v2833_v50  ;;  %vm948_vm14 = vcmp.eq.f32.partialorder %v2615_v63, %v2835_v40  ;;  %961 = vmin.xlane.f32.xlu2 %v2842_v21  ;;  %v1049_v63 = vsel %vm243_vm0, %v2855_v23, -inf  ;;  %v953_v37 = vcvt.f32.s32 %v2835_v40 }
 0x1f0   :  { %v949_v43 = vsel %vm948_vm14, %v944_v41, inf  ;;  %v2897_v41 = vld [vmem:[%s3442_s1 + $0x50] sm:$0xff] }
 0x1f1   :  { %950 = vmin.xlane.f32.xlu1 %v949_v43  ;;  %v1076_v43 = vsel %vm243_vm0, %v2897_v41, -inf }
 0x1f7   :  { %1050 = vmax.xlane.f32.xlu2 %v1049_v63 }
 0x1f9   :  { %1047 = vmax.xlane.f32.xlu1 %v1046_v22  ;;  %v2904_v22 = vld [vmem:[%s3442_s1 + $0x60] sm:$0xff] }
 0x1fa   :  { %v1082_v63 = vsel %vm243_vm0, %v2904_v22, -inf }
 0x1ff   :  { %1059 = vmax.xlane.f32.xlu2 %v1058_v49 }
 0x201   :  { %1056 = vmax.xlane.f32.xlu1 %v1055_v52  ;;  %v2911_v52 = vld [vmem:[%s3442_s1 + $0x68] sm:$0xff] }
 0x202   :  { %v1085_v49 = vsel %vm243_vm0, %v2911_v52, -inf }
 0x207   :  { %1068 = vmax.xlane.f32.xlu2 %v1067_v17 }
 0x209   :  { %1065 = vmax.xlane.f32.xlu1 %v1064_v18  ;;  %v2918_v18 = vld [vmem:[%s3442_s1 + $0x80] sm:$0xff] }
 0x20a   :  { %v1094_v17 = vsel %vm243_vm0, %v2918_v18, -inf }
 0x20f   :  { %1077 = vmax.xlane.f32.xlu2 %v1076_v43 }
 0x211   :  { %1074 = vmax.xlane.f32.xlu1 %v1073_v20  ;;  %v2925_v20 = vld [vmem:[%s3442_s1 + $0x98] sm:$0xff] }
 0x212   :  { %v1103_v43 = vsel %vm243_vm0, %v2925_v20, -inf }
 0x217   :  { %1086 = vmax.xlane.f32.xlu2 %v1085_v49 }
 0x219   :  { %1083 = vmax.xlane.f32.xlu1 %v1082_v63  ;;  %v2932_v63 = vld [vmem:[%s3442_s1 + $0xb0] sm:$0xff] }
 0x21a   :  { %v1112_v49 = vsel %vm243_vm0, %v2932_v63, -inf }
 0x21f   :  { %1095 = vmax.xlane.f32.xlu2 %v1094_v17  ;;  %v2939_v17 = vld [vmem:[%s3442_s1 + $0x78] sm:$0xff] }
 0x220   :  { %v1091_v38 = vsel %vm243_vm0, %v2939_v17, -inf }
 0x221   :  { %1092 = vmax.xlane.f32.xlu1 %v1091_v38 }
 0x227   :  { %1104 = vmax.xlane.f32.xlu2 %v1103_v43  ;;  %v938_v43 = vcvt.f32.s32 %v2811_v4  ;;  %v3553_v4 = vmov 0.0  }
 0x228   :  { %v542_v5 = vsel %vm492_vm3, 1.0, %v3553_v4 }
 0x229   :  { %v939_v56 = vshll.u32 %v938_v43, 16  ;;  %v954_v43 = vshll.u32 %v953_v37, 16 }
 0x22f   :  { %1113 = vmax.xlane.f32.xlu2 %v1112_v49  ;;  %v2948_v49 = vld [vmem:[%s3442_s1 + $0x90] sm:$0xff] }
 0x230   :  { %3552 = vst [vmem:[#allocation26_spill] sm:$0xff] %v2948_v49  ;;  %v1100_v38 = vsel %vm243_vm0, %v2948_v49, -inf }
 0x231   :  { %1101 = vmax.xlane.f32.xlu1 %v1100_v38 }
 0x25a   :  { %v936_v10 = vpop.xlane.xlu2 %935 }
 0x25b   :  { %v937_v11 = vcvt.f32.s32 %v936_v10  ;;  %v541_v10 = vsel %vm491_vm15, 1.0, %v3553_v4 }
 0x25d   :  { %v940_v12 = vadd.s32 %v939_v56, %v937_v11 }
 0x25f   :  { %vm993_vm1 = vcmp.eq.s32.totalorder %v2095_v51, %v940_v12 }
 0x260   :  { %v2957_v30 = vsel %vm993_vm1, 1.0, %v3553_v4 }
 0x261   :  { %3554 = vst [vmem:[#allocation25_spill] sm:$0xff] %v2957_v30  ;;  %v2960_v56 = vmul.f32 %v2957_v30, %v541_v10 }
 0x262   :  { %v2962_v9 = vpop.xlane.xlu2 %961 }
 0x263   :  { %3555 = vst [vmem:[#allocation27_spill] sm:$0xff] %v2960_v56  ;;  %vm963_vm2 = vcmp.eq.f32.partialorder %v2842_v21, %v2962_v9  ;;  %v1052_v21 = vsel %vm243_vm0, %v2980_v54, -inf }
 0x264   :  { %v951_v11 = vpop.xlane.xlu1 %950  ;;  %v964_v38 = vsel %vm963_vm2, %v959_v31, inf }
 0x265   :  { %v952_v40 = vcvt.f32.s32 %v951_v11  ;;  %965 = vmin.xlane.f32.xlu0 %v964_v38 }
 0x267   :  { %v955_v12 = vadd.s32 %v954_v43, %v952_v40 }
 0x269   :  { %vm994_vm4 = vcmp.eq.s32.totalorder %v2095_v51, %v955_v12  ;;  %v2998_v12 = vld [vmem:[%s3442_s1 + $0x28] sm:$0xff] }
 0x26a   :  { %v2970_v10 = vsel %vm994_vm4, 1.0, %v3553_v4  ;;  %3563 = vst [vmem:[#allocation37_spill] sm:$0xff] %v2998_v12 }
 0x26b   :  { %3557 = vst [vmem:[#allocation24_spill] sm:$0xff] %v2970_v10  ;;  %v2973_v37 = vmul.f32 %v2970_v10, %v542_v5  ;;  %v2989_v5 = vld [vmem:[%s3442_s1 + $0xa8] sm:$0xff] }
 0x26c   :  { %v2975_v11 = vpop.xlane.xlu1 %1047  ;;  %3561 = vst [vmem:[#allocation35_spill] sm:$0xff] %v2989_v5  ;;  %v1109_v40 = vsel %vm243_vm0, %v2989_v5, -inf  ;;  %v3012_v5 = vld [vmem:[%s3442_s1 + $0x40] sm:$0xff] }
 0x26d   :  { %3558 = vst [vmem:[#allocation32_spill] sm:$0xff] %v2973_v37  ;;  %v1121_v13 = vsub.f32 %v2848_v0, %v2975_v11  ;;  %1053 = vmax.xlane.f32.xlu0 %v1052_v21  ;;  %1110 = vmax.xlane.f32.xlu1 %v1109_v40 }
 0x26e   :  { %3559 = vst [vmem:[#allocation33_spill] sm:$0xff] %v2975_v11  ;;  %v3005_v11 = vpop.xlane.xlu2 %1050 }
 0x26f   :  { %v1146_v43 = vmul.f32 1.442695, %v1121_v13  ;;  %v1061_v13 = vsel %vm243_vm0, %v2998_v12, -inf  ;;  %3564 = vst [vmem:[#allocation38_spill] sm:$0xff] %v3005_v11  ;;  %v607_v12 = vcvt.f32.s32 %v2619_v39 }
 0x270   :  { %3566 = vst [vmem:[#allocation40_spill] sm:$0xff] %v3012_v5 }
 0x271   :  { %1744 = vpow2.f32 %v1146_v43 }
 0x274   :  { %v2993_v31 = vpop.xlane.xlu1 %1056 }
 0x275   :  { %3562 = vst [vmem:[#allocation36_spill] sm:$0xff] %v2993_v31  ;;  %v1124_v38 = vsub.f32 %v2862_v27, %v2993_v31  ;;  %1062 = vmax.xlane.f32.xlu0 %v1061_v13 }
 0x276   :  { %v3026_v45 = vpop.xlane.xlu2 %1059 }
 0x277   :  { %v1745_v21 = vpop.eup %1744  ;;  %v1152_v30 = vmul.f32 1.442695, %v1124_v38  ;;  %v1070_v38 = vsel %vm243_vm0, %v3012_v5, -inf }
 0x278   :  { %v1196_v43 = vsel %vm243_vm0, %v1745_v21, 0.0 }
 0x279   :  { %1746 = vpow2.f32 %v1152_v30  ;;  %1197 = vadd.xlane.f32.xlu2 %v1196_v43  ;;  %v3022_v30 = vld [vmem:[%s3442_s1 + $0xc0] sm:$0xff] }
 0x27a   :  { %3567 = vst [vmem:[#allocation41_spill] sm:$0xff] %v3022_v30  ;;  %v1118_v43 = vsel %vm243_vm0, %v3022_v30, -inf }
 0x27b   :  { %1119 = vmax.xlane.f32.xlu1 %v1118_v43 }
 0x27c   :  { %v3007_v40 = vpop.xlane.xlu1 %1065 }
 0x27d   :  { %3565 = vst [vmem:[#allocation39_spill] sm:$0xff] %v3007_v40  ;;  %v1127_v31 = vsub.f32 %v2876_v19, %v3007_v40  ;;  %1071 = vmax.xlane.f32.xlu0 %v1070_v38 }
 0x27f   :  { %v1747_v13 = vpop.eup %1746  ;;  %v1158_v10 = vmul.f32 1.442695, %v1127_v31  ;;  %v3033_v31 = vld [vmem:[%s3442_s1 + $0x58] sm:$0xff] }
 0x280   :  { %v1205_v21 = vsel %vm243_vm0, %v1747_v13, 0.0  ;;  %3569 = vst [vmem:[#allocation43_spill] sm:$0xff] %v3033_v31  ;;  %v3570_v13 = vld [vmem:[#allocation9_spill] sm:$0xff] }
 0x281   :  { %1748 = vpow2.f32 %v1158_v10  ;;  %1206 = vadd.xlane.f32.xlu2 %v1205_v21  ;;  %v1079_v10 = vsel %vm243_vm0, %v3033_v31, -inf  ;;  %v608_v21 = vcvt.f32.s32 %v3570_v13  ;;  %v3049_v31 = vpop.xlane.xlu2 %1068  ;;  %v3062_v13 = vld [vmem:[%s3442_s1 + $0x88] sm:$0xff] }
 0x283   :  { %v609_v59 = vshll.u32 %v608_v21, 16 }
 0x284   :  { %v3028_v40 = vpop.xlane.xlu1 %1074 }
 0x285   :  { %3568 = vst [vmem:[#allocation42_spill] sm:$0xff] %v3028_v40  ;;  %v1130_v38 = vsub.f32 %v2890_v44, %v3028_v40  ;;  %1080 = vmax.xlane.f32.xlu0 %v1079_v10  ;;  %v610_v49 = vadd.s32 %v609_v59, %v607_v12  ;;  %v3047_v40 = vld [vmem:[%s3442_s1 + $0x70] sm:$0xff]  ;;  %v3572_v12 = vld [vmem:[#allocation11_spill] sm:$0xff] }
 0x286   :  { %v1088_v39 = vsel %vm243_vm0, %v3047_v40, -inf  ;;  %vm469_vm6 = vcmp.lt.f32.partialorder %v3572_v12, 6.6666665  ;;  %3573 = vst [vmem:[#allocation11_spill] sm:$0xff] %v3062_v13 }
 0x287   :  { %v1749_v5 = vpop.eup %1748  ;;  %v1164_v30 = vmul.f32 1.442695, %v1130_v38  ;;  %vm971_vm5 = vcmp.eq.s32.totalorder %v2095_v51, %v610_v49  ;;  %v519_v21 = vsel %vm469_vm6, 1.0, %v3553_v4  ;;  %v3574_v49 = vld [vmem:[#allocation10_spill] sm:$0xff] }
 0x288   :  { %v1214_v43 = vsel %vm243_vm0, %v1749_v5, 0.0  ;;  %v1666_v10 = vsel %vm971_vm5, 1.0, %v3553_v4  ;;  %vm471_vm8 = vcmp.lt.f32.partialorder %v3574_v49, 6.6666665 }
 0x289   :  { %1750 = vpow2.f32 %v1164_v30  ;;  %1215 = vadd.xlane.f32.xlu2 %v1214_v43  ;;  %v1097_v43 = vsel %vm243_vm0, %v3062_v13, -inf  ;;  %v521_v12 = vsel %vm471_vm8, 1.0, %v3553_v4  ;;  %v1122_v13 = vsub.f32 %v2855_v23, %v3005_v11 }
 0x28a   :  { %v1501_v11 = vsel %vm243_vm0, %v2645_v28, 0.0 }
 0x28c   :  { %v3042_v54 = vpop.xlane.xlu1 %1083 }
 0x28d   :  { %3571 = vst [vmem:[#allocation9_spill] sm:$0xff] %v3042_v54  ;;  %v1133_v38 = vsub.f32 %v2904_v22, %v3042_v54  ;;  %1089 = vmax.xlane.f32.xlu0 %v1088_v39  ;;  %v3072_v39 = vmul.f32 %v1666_v10, %v519_v21 }
 0x28f   :  { %v1751_v5 = vpop.eup %1750  ;;  %v1170_v30 = vmul.f32 1.442695, %v1133_v38  ;;  %v3070_v38 = vpop.xlane.xlu2 %1077  ;;  %3575 = vst [vmem:[#allocation10_spill] sm:$0xff] %v3072_v39  ;;  %v1496_v49 = vsel %vm243_vm0, %v3072_v39, 0.0 }
 0x290   :  { %v1223_v59 = vsel %vm243_vm0, %v1751_v5, 0.0  ;;  %v1498_v21 = vadd.f32 %v1497_v14, %v1496_v49 }
 0x291   :  { %1752 = vpow2.f32 %v1170_v30  ;;  %1224 = vadd.xlane.f32.xlu2 %v1223_v59  ;;  %v3075_v30 = vsel %vm973_vm7, 1.0, %v3553_v4 }
 0x292   :  { %3576 = vst [vmem:[#allocation44_spill] sm:$0xff] %v3075_v30  ;;  %v3084_v54 = vmul.f32 %v3075_v30, %v521_v12  ;;  %v1148_v12 = vmul.f32 1.442695, %v1122_v13  ;;  %v1125_v30 = vsub.f32 %v2869_v34, %v3026_v45  ;;  %v1349_v13 = vmul.f32 %v2636_v33, %v2862_v27 }
 0x293   :  { %v1128_v33 = vsub.f32 %v2883_v32, %v3049_v31  ;;  %v1507_v27 = vsel %vm243_vm0, %v2675_v55, 0.0 }
 0x294   :  { %3577 = vst [vmem:[#allocation45_spill] sm:$0xff] %v3084_v54  ;;  %v1499_v3 = vsel %vm243_vm0, %v3084_v54, 0.0  ;;  %1754 = vpow2.f32 %v1148_v12  ;;  %v1352_v54 = vmul.f32 %v2667_v2, %v2876_v19 }
 0x295   :  { %1098 = vmax.xlane.f32.xlu0 %v1097_v43  ;;  %v3091_v43 = vld [vmem:[%s3442_s1 + $0xa0] sm:$0xff]  ;;  %v1500_v39 = vadd.f32 %v1499_v3, %v1498_v21  ;;  %v3110_v3 = vld [vmem:[%s3442_s1 + $0xb8] sm:$0xff] }
 0x296   :  { %v1115_v21 = vsel %vm243_vm0, %v3110_v3, -inf  ;;  %v1389_v2 = vsel %vm243_vm0, %v1352_v54, 0.0  ;;  %v1513_v54 = vsel %vm243_vm0, %v2708_v35, 0.0 }
 0x297   :  { %v1753_v5 = vpop.eup %1752  ;;  %v3099_v49 = vpop.xlane.xlu2 %1086 }
 0x298   :  { %v1232_v59 = vsel %vm243_vm0, %v1753_v5, 0.0  ;;  %v1346_v5 = vmul.f32 %v1666_v10, %v2848_v0  ;;  %v1503_v0 = vsel %vm243_vm0, %v2682_v58, 0.0  ;;  %v1502_v10 = vadd.f32 %v1501_v11, %v1500_v39 }
 0x299   :  { %1233 = vadd.xlane.f32.xlu2 %v1232_v59  ;;  %v1106_v59 = vsel %vm243_vm0, %v3091_v43, -inf  ;;  %v1380_v11 = vsel %vm243_vm0, %v1349_v13, 0.0  ;;  %v1505_v39 = vsel %vm243_vm0, %v2655_v47, 0.0 }
 0x29a   :  { %v1371_v14 = vsel %vm243_vm0, %v1346_v5, 0.0  ;;  %v1504_v5 = vadd.f32 %v1503_v0, %v1502_v10 }
 0x29c   :  { %v1506_v12 = vadd.f32 %v1505_v39, %v1504_v5  ;;  %v1160_v5 = vmul.f32 1.442695, %v1128_v33  ;;  %v1515_v33 = vsel %vm243_vm0, %v2745_v46, 0.0 }
 0x29d   :  { %1107 = vmax.xlane.f32.xlu0 %v1106_v59  ;;  %v1154_v59 = vmul.f32 1.442695, %v1125_v30  ;;  %v1509_v30 = vsel %vm243_vm0, %v2715_v57, 0.0 }
 0x29e   :  { %v1508_v13 = vadd.f32 %v1507_v27, %v1506_v12 }
 0x29f   :  { %v3119_v58 = vpop.xlane.xlu2 %1095  ;;  %1756 = vpow2.f32 %v1154_v59 }
 0x2a0   :  { %3578 = vst [vmem:[#allocation46_spill] sm:$0xff] %v3119_v58  ;;  %v1137_v10 = vsub.f32 %v2918_v18, %v3119_v58  ;;  %1758 = vpow2.f32 %v1160_v5  ;;  %v1355_v58 = vmul.f32 %v2697_v6, %v2890_v44  ;;  %v1134_v44 = vsub.f32 %v2911_v52, %v3099_v49 }
 0x2a1   :  { %1372 = vadd.xlane.f32.xlu2 %v1371_v14  ;;  %v1755_v14 = vpop.eup %1754  ;;  %v1517_v5 = vsel %vm243_vm0, %v2712_v26, 0.0 }
 0x2a2   :  { %v1199_v0 = vsel %vm243_vm0, %v1755_v14, 0.0  ;;  %v1178_v19 = vmul.f32 1.442695, %v1137_v10  ;;  %v1131_v14 = vsub.f32 %v2897_v41, %v3070_v38 }
 0x2a4   :  { %1760 = vpow2.f32 %v1178_v19 }
 0x2a5   :  { %1116 = vmax.xlane.f32.xlu0 %v1115_v21  ;;  %v1510_v21 = vadd.f32 %v1509_v30, %v1508_v13  ;;  %v1757_v59 = vpop.eup %1756  ;;  %v1166_v30 = vmul.f32 1.442695, %v1131_v14  ;;  %v1521_v14 = vsel %vm243_vm0, %v2778_v15, 0.0 }
 0x2a6   :  { %v1208_v12 = vsel %vm243_vm0, %v1757_v59, 0.0  ;;  %v1759_v13 = vpop.eup %1758 }
 0x2a7   :  { %1762 = vpow2.f32 %v1166_v30  ;;  %v1358_v30 = vmul.f32 %v2727_v36, %v2904_v22  ;;  %v1527_v36 = vsel %vm243_vm0, %v2809_v25, 0.0 }
 0x2a9   :  { %1381 = vadd.xlane.f32.xlu2 %v1380_v11  ;;  %v1511_v11 = vsel %vm243_vm0, %v2685_v7, 0.0 }
 0x2aa   :  { %v1512_v39 = vadd.f32 %v1511_v11, %v1510_v21  ;;  %v3145_v21 = vpop.xlane.xlu2 %1104  ;;  %v1761_v6 = vpop.eup %1760  ;;  %v1172_v11 = vmul.f32 1.442695, %v1134_v44 }
 0x2ab   :  { %v1140_v19 = vsub.f32 %v2925_v20, %v3145_v21 }
 0x2ac   :  { %v1514_v27 = vadd.f32 %v1513_v54, %v1512_v39  ;;  %v1519_v39 = vsel %vm243_vm0, %v2738_v60, 0.0  ;;  %1764 = vpow2.f32 %v1172_v11 }
 0x2ad   :  { %1200 = vadd.xlane.f32.xlu0 %v1199_v0  ;;  %v1398_v0 = vsel %vm243_vm0, %v1355_v58, 0.0  ;;  %v1244_v58 = vsel %vm243_vm0, %v1761_v6, 0.0  ;;  %v1407_v6 = vsel %vm243_vm0, %v1358_v30, 0.0  ;;  %v1531_v30 = vsel %vm243_vm0, %v2800_v16, 0.0 }
 0x2ae   :  { %v1516_v10 = vadd.f32 %v1515_v33, %v1514_v27  ;;  %v1763_v33 = vpop.eup %1762 }
 0x2b0   :  { %v1518_v59 = vadd.f32 %v1517_v5, %v1516_v10  ;;  %v1523_v10 = vsel %vm243_vm0, %v2742_v24, 0.0 }
 0x2b1   :  { %1390 = vadd.xlane.f32.xlu2 %v1389_v2  ;;  %v1217_v2 = vsel %vm243_vm0, %v1759_v13, 0.0 }
 0x2b2   :  { %v1520_v54 = vadd.f32 %v1519_v39, %v1518_v59  ;;  %v1765_v44 = vpop.eup %1764  ;;  %v3165_v5 = vpop.xlane.xlu2 %1113 }
 0x2b3   :  { %3579 = vst [vmem:[#allocation47_spill] sm:$0xff] %v3165_v5  ;;  %v1235_v59 = vsel %vm243_vm0, %v1765_v44, 0.0  ;;  %v968_v44 = vcvt.f32.s32 %v2962_v9 }
 0x2b4   :  { %v1522_v27 = vadd.f32 %v1521_v14, %v1520_v54  ;;  %v1529_v14 = vsel %vm243_vm0, %v2775_v61, 0.0 }
 0x2b5   :  { %1209 = vadd.xlane.f32.xlu0 %v1208_v12  ;;  %v1184_v12 = vmul.f32 1.442695, %v1140_v19 }
 0x2b6   :  { %v1524_v13 = vadd.f32 %v1523_v10, %v1522_v27  ;;  %v1361_v27 = vmul.f32 %v2757_v8, %v2939_v17  ;;  %v1535_v8 = vsel %vm243_vm0, %v2806_v29, 0.0 }
 0x2b7   :  { %1766 = vpow2.f32 %v1184_v12 }
 0x2b9   :  { %1399 = vadd.xlane.f32.xlu2 %v1398_v0  ;;  %v1226_v0 = vsel %vm243_vm0, %v1763_v33, 0.0  ;;  %v1347_v33 = vmul.f32 %v2639_v48, %v2855_v23  ;;  %v3188_v48 = vpop.xlane.xlu1 %1092 }
 0x2ba   :  { %v1136_v9 = vsub.f32 %v2939_v17, %v3188_v48  ;;  %v1541_v17 = vsel %vm243_vm0, %v2973_v37, 0.0 }
 0x2bd   :  { %1218 = vadd.xlane.f32.xlu0 %v1217_v2  ;;  %v1525_v2 = vsel %vm243_vm0, %v2765_v1, 0.0  ;;  %v1767_v22 = vpop.eup %1766 }
 0x2be   :  { %v1526_v19 = vadd.f32 %v1525_v2, %v1524_v13  ;;  %v1253_v39 = vsel %vm243_vm0, %v1767_v22, 0.0  ;;  %v1374_v13 = vsel %vm243_vm0, %v1347_v33, 0.0  ;;  %v1416_v2 = vsel %vm243_vm0, %v1361_v27, 0.0 }
 0x2bf   :  { %v1350_v22 = vmul.f32 %v2670_v62, %v2869_v34  ;;  %v1176_v34 = vmul.f32 1.442695, %v1136_v9 }
 0x2c0   :  { %v1528_v11 = vadd.f32 %v1527_v36, %v1526_v19 }
 0x2c1   :  { %1245 = vadd.xlane.f32.xlu2 %v1244_v58  ;;  %v1143_v58 = vsub.f32 %v2932_v63, %v3165_v5  ;;  %v1383_v33 = vsel %vm243_vm0, %v1350_v22, 0.0 }
 0x2c2   :  { %v1530_v54 = vadd.f32 %v1529_v14, %v1528_v11  ;;  %v3580_v11 = vld [vmem:[#allocation28_spill] sm:$0xff] }
 0x2c3   :  { %v1190_v12 = vmul.f32 1.442695, %v1143_v58  ;;  %vm493_vm9 = vcmp.lt.f32.partialorder %v3580_v11, 6.6666665 }
 0x2c4   :  { %v1532_v10 = vadd.f32 %v1531_v30, %v1530_v54  ;;  %v1539_v54 = vsel %vm243_vm0, %v2960_v56, 0.0  ;;  %v543_v27 = vsel %vm493_vm9, 1.0, %v3553_v4 }
 0x2c5   :  { %1227 = vadd.xlane.f32.xlu0 %v1226_v0  ;;  %v1533_v0 = vsel %vm243_vm0, %v2838_v53, 0.0  ;;  %1768 = vpow2.f32 %v1190_v12  ;;  %v1537_v12 = vsel %vm243_vm0, %v2833_v50, 0.0 }
 0x2c6   :  { %1770 = vpow2.f32 %v1176_v34 }
 0x2c9   :  { %1408 = vadd.xlane.f32.xlu2 %v1407_v6  ;;  %v1534_v6 = vadd.f32 %v1533_v0, %v1532_v10 }
 0x2cb   :  { %v1769_v23 = vpop.eup %1768  ;;  %v1536_v19 = vadd.f32 %v1535_v8, %v1534_v6  ;;  %v3583_v8 = vld [vmem:[#allocation26_spill] sm:$0xff] }
 0x2cc   :  { %v1262_v14 = vsel %vm243_vm0, %v1769_v23, 0.0  ;;  %v3584_v23 = vld [vmem:[#allocation20_spill] sm:$0xff]  ;;  %v1771_v11 = vpop.eup %1770 }
 0x2cd   :  { %1236 = vadd.xlane.f32.xlu0 %v1235_v59  ;;  %v969_v59 = vshll.u32 %v968_v44, 16  ;;  %v1538_v62 = vadd.f32 %v1537_v12, %v1536_v19  ;;  %v3582_v44 = vld [vmem:[#allocation34_spill] sm:$0xff]  ;;  %v3585_v12 = vld [vmem:[#allocation37_spill] sm:$0xff] }
 0x2cf   :  { %v1540_v0 = vadd.f32 %v1539_v54, %v1538_v62 }
 0x2d1   :  { %1254 = vadd.xlane.f32.xlu2 %v1253_v39  ;;  %v1542_v6 = vadd.f32 %v1541_v17, %v1540_v0  ;;  %v1241_v17 = vsel %vm243_vm0, %v1771_v11, 0.0 }
 0x2d5   :  { %1375 = vadd.xlane.f32.xlu0 %v1374_v13 }
 0x2d8   :  { %v966_v36 = vpop.xlane.xlu0 %965 }
 0x2d9   :  { %1417 = vadd.xlane.f32.xlu2 %v1416_v2  ;;  %v967_v58 = vcvt.f32.s32 %v966_v36  ;;  %v1364_v36 = vmul.f32 %v3584_v23, %v3583_v8 }
 0x2db   :  { %v970_v39 = vadd.s32 %v969_v59, %v967_v58 }
 0x2dd   :  { %vm995_vm10 = vcmp.eq.s32.totalorder %v2095_v51, %v970_v39  ;;  %1384 = vadd.xlane.f32.xlu0 %v1383_v33  ;;  %v1353_v51 = vmul.f32 %v2700_v42, %v2883_v32  ;;  %v1425_v42 = vsel %vm243_vm0, %v1364_v36, 0.0  ;;  %v3225_v32 = vpop.xlane.xlu1 %1101  ;;  %v3586_v33 = vld [vmem:[#allocation18_spill] sm:$0xff] }
 0x2de   :  { %v3208_v30 = vsel %vm995_vm10, 1.0, %v3553_v4  ;;  %v1366_v62 = vmul.f32 %v3586_v33, %v3091_v43  ;;  %v1139_v34 = vsub.f32 %v3583_v8, %v3225_v32  ;;  %v3587_v8 = vld [vmem:[#allocation43_spill] sm:$0xff] }
 0x2df   :  { %v3211_v10 = vmul.f32 %v3208_v30, %v543_v27  ;;  %v1392_v59 = vsel %vm243_vm0, %v1353_v51, 0.0 }
 0x2e0   :  { %v3213_v13 = vpop.xlane.xlu0 %1053  ;;  %v1431_v23 = vsel %vm243_vm0, %v1366_v62, 0.0  ;;  %v1182_v36 = vmul.f32 1.442695, %v1139_v34 }
 0x2e1   :  { %1263 = vadd.xlane.f32.xlu2 %v1262_v14  ;;  %3581 = vst [vmem:[#allocation28_spill] sm:$0xff] %v3211_v10  ;;  %v1123_v2 = vsub.f32 %v3582_v44, %v3213_v13  ;;  %v1543_v4 = vsel %vm243_vm0, %v3211_v10, 0.0 }
 0x2e2   :  { %v1544_v22 = vadd.f32 %v1543_v4, %v1542_v6 }
 0x2e3   :  { %v1150_v19 = vmul.f32 1.442695, %v1123_v2 }
 0x2e4   :  { %v1545_v58 = vrot.slane %v1544_v22, 4 }
 0x2e5   :  { %1772 = vpow2.f32 %v1150_v19  ;;  %1393 = vadd.xlane.f32.xlu0 %v1392_v59  ;;  %v3588_v19 = vld [vmem:[#allocation13_spill] sm:$0xff] }
 0x2e6   :  { %v1546_v9 = vadd.f32 %v1545_v58, %v1544_v22  ;;  %v1357_v59 = vmul.f32 %v3588_v19, %v3587_v8  ;;  %v3589_v58 = vld [vmem:[#allocation40_spill] sm:$0xff] }
 0x2e8   :  { %v3227_v39 = vpop.xlane.xlu0 %1062  ;;  %v1547_v14 = vrot.slane %v1546_v9, 2  ;;  %v1404_v33 = vsel %vm243_vm0, %v1357_v59, 0.0 }
 0x2e9   :  { %1426 = vadd.xlane.f32.xlu2 %v1425_v42  ;;  %v1126_v54 = vsub.f32 %v3585_v12, %v3227_v39 }
 0x2ea   :  { %v1548_v27 = vadd.f32 %v1547_v14, %v1546_v9  ;;  %v3590_v9 = vld [vmem:[#allocation24_spill] sm:$0xff] }
 0x2eb   :  { %v1773_v0 = vpop.eup %1772  ;;  %v1156_v51 = vmul.f32 1.442695, %v1126_v54  ;;  %v1369_v11 = vmul.f32 %v3590_v9, %v3110_v3  ;;  %v3592_v9 = vld [vmem:[#allocation17_spill] sm:$0xff] }
 0x2ec   :  { %v1202_v6 = vsel %vm243_vm0, %v1773_v0, 0.0  ;;  %v1549_v2 = vrot.slane %v1548_v27, 1 }
 0x2ed   :  { %1774 = vpow2.f32 %v1156_v51  ;;  %1242 = vadd.xlane.f32.xlu0 %v1241_v17  ;;  %1203 = vadd.xlane.f32.xlu1 %v1202_v6  ;;  %v1440_v34 = vsel %vm243_vm0, %v1369_v11, 0.0  ;;  %v3250_v17 = vpop.xlane.xlu1 %1110  ;;  %v3591_v6 = vld [vmem:[#allocation35_spill] sm:$0xff]  ;;  %v1360_v11 = vmul.f32 %v3592_v9, %v3047_v40 }
 0x2ee   :  { %v1550_v4 = vadd.f32 %v1549_v2, %v1548_v27  ;;  %1776 = vpow2.f32 %v1182_v36  ;;  %v1142_v2 = vsub.f32 %v3591_v6, %v3250_v17 }
 0x2f0   :  { %v3238_v22 = vpop.xlane.xlu0 %1071  ;;  %1552 = vst.msk [vmem:[#allocation2] sm:$0x1] %vm1551_vm11, %v1550_v4  ;;  %v1188_v59 = vmul.f32 1.442695, %v1142_v2  ;;  %v3594_v2 = vld [vmem:[#allocation41_spill] sm:$0xff] }
 0x2f1   :  { %1432 = vadd.xlane.f32.xlu2 %v1431_v23  ;;  %v1129_v42 = vsub.f32 %v3589_v58, %v3238_v22  ;;  %1644 = dma.vmem_to_hbm [thread:$0]  %s1640_s7, 16, %s1642_s5, [#allocation3]  }
 0x2f3   :  { %v1775_v14 = vpop.eup %1774  ;;  %v1162_v54 = vmul.f32 1.442695, %v1129_v42 }
 0x2f4   :  { %v1211_v62 = vsel %vm243_vm0, %v1775_v14, 0.0  ;;  %v1777_v27 = vpop.eup %1776 }
 0x2f5   :  { %1778 = vpow2.f32 %v1162_v54  ;;  %1405 = vadd.xlane.f32.xlu0 %v1404_v33  ;;  %1212 = vadd.xlane.f32.xlu1 %v1211_v62  ;;  %v1250_v23 = vsel %vm243_vm0, %v1777_v27, 0.0  ;;  %v1413_v33 = vsel %vm243_vm0, %v1360_v11, 0.0  ;;  %v3595_v11 = vld [vmem:[#allocation11_spill] sm:$0xff] }
 0x2f8   :  { %v3252_v0 = vpop.xlane.xlu0 %1080 }
 0x2f9   :  { %1441 = vadd.xlane.f32.xlu2 %v1440_v34  ;;  %v1132_v51 = vsub.f32 %v3587_v8, %v3252_v0  ;;  %v3268_v34 = vpop.xlane.xlu1 %1119 }
 0x2fa   :  { %3593 = vst [vmem:[#allocation34_spill] sm:$0xff] %v3268_v34 }
 0x2fb   :  { %v1779_v36 = vpop.eup %1778  ;;  %v1168_v4 = vmul.f32 1.442695, %v1132_v51 }
 0x2fc   :  { %v1220_v19 = vsel %vm243_vm0, %v1779_v36, 0.0 }
 0x2fd   :  { %1780 = vpow2.f32 %v1168_v4  ;;  %1251 = vadd.xlane.f32.xlu0 %v1250_v23  ;;  %1221 = vadd.xlane.f32.xlu1 %v1220_v19  ;;  %v1145_v23 = vsub.f32 %v3594_v2, %v3268_v34  ;;  %v3607_v34 = vld [vmem:[#allocation10_spill] sm:$0xff] }
 0x2fe   :  { %1782 = vpow2.f32 %v1188_v59  ;;  %v1198_v59 = vpop.xlane.xlu2 %1197 }
 0x2ff   :  { %v1194_v19 = vmul.f32 1.442695, %v1145_v23  ;;  %v3599_v23 = vld [vmem:[#allocation29_spill] sm:$0xff] }
 0x300   :  { %v3260_v42 = vpop.xlane.xlu0 %1089 }
 0x301   :  { %v1135_v8 = vsub.f32 %v3047_v40, %v3260_v42 }
 0x303   :  { %v1781_v14 = vpop.eup %1780  ;;  %v1174_v54 = vmul.f32 1.442695, %v1135_v8  ;;  %v3596_v8 = vld [vmem:[#allocation15_spill] sm:$0xff] }
 0x304   :  { %v1229_v62 = vsel %vm243_vm0, %v1781_v14, 0.0  ;;  %v1783_v27 = vpop.eup %1782  ;;  %v1363_v14 = vmul.f32 %v3596_v8, %v3595_v11 }
 0x305   :  { %1784 = vpow2.f32 %v1174_v54  ;;  %1414 = vadd.xlane.f32.xlu0 %v1413_v33  ;;  %1230 = vadd.xlane.f32.xlu1 %v1229_v62  ;;  %v1259_v36 = vsel %vm243_vm0, %v1783_v27, 0.0  ;;  %v3597_v54 = vld [vmem:[#allocation44_spill] sm:$0xff] }
 0x306   :  { %v1348_v33 = vmul.f32 %v3597_v54, %v3582_v44  ;;  %1786 = vpow2.f32 %v1194_v19  ;;  %v1422_v62 = vsel %vm243_vm0, %v1363_v14, 0.0  ;;  %v3288_v10 = vpop.xlane.xlu2 %1206  ;;  %v3600_v19 = vld [vmem:[#allocation8_spill] sm:$0xff]  ;;  %v3601_v54 = vld [vmem:[#allocation31_spill] sm:$0xff] }
 0x307   :  { %v1367_v14 = vmul.f32 %v3600_v19, %v3591_v6  ;;  %v1370_v6 = vmul.f32 %v3208_v30, %v3594_v2 }
 0x308   :  { %v3270_v51 = vpop.xlane.xlu0 %1098  ;;  %v1377_v27 = vsel %vm243_vm0, %v1348_v33, 0.0  ;;  %v1354_v33 = vmul.f32 %v3601_v54, %v3589_v58 }
 0x30b   :  { %v1785_v40 = vpop.eup %1784 }
 0x30c   :  { %v1238_v4 = vsel %vm243_vm0, %v1785_v40, 0.0  ;;  %v1787_v40 = vpop.eup %1786 }
 0x30d   :  { %1260 = vadd.xlane.f32.xlu0 %v1259_v36  ;;  %1239 = vadd.xlane.f32.xlu1 %v1238_v4  ;;  %v1351_v4 = vmul.f32 %v3599_v23, %v3585_v12  ;;  %v1268_v8 = vsel %vm243_vm0, %v1787_v40, 0.0  ;;  %v1434_v12 = vsel %vm243_vm0, %v1367_v14, 0.0  ;;  %v1395_v40 = vsel %vm243_vm0, %v1354_v33, 0.0 }
 0x30f   :  { %v1386_v56 = vsel %vm243_vm0, %v1351_v4, 0.0  ;;  %v3602_v4 = vld [vmem:[#allocation12_spill] sm:$0xff] }
 0x310   :  { %v3276_v9 = vpop.xlane.xlu0 %1107  ;;  %v1356_v58 = vmul.f32 %v3602_v4, %v2897_v41 }
 0x311   :  { %v1141_v33 = vsub.f32 %v3091_v43, %v3276_v9 }
 0x313   :  { %v1186_v2 = vmul.f32 1.442695, %v1141_v33  ;;  %v3604_v33 = vld [vmem:[#allocation33_spill] sm:$0xff] }
 0x315   :  { %1423 = vadd.xlane.f32.xlu0 %v1422_v62  ;;  %1378 = vadd.xlane.f32.xlu1 %v1377_v27  ;;  %v1138_v62 = vsub.f32 %v3595_v11, %v3270_v51  ;;  %v3298_v27 = vpop.xlane.xlu2 %1215  ;;  %v1443_v11 = vsel %vm243_vm0, %v1370_v6, 0.0 }
 0x317   :  { %v1180_v23 = vmul.f32 1.442695, %v1138_v62 }
 0x318   :  { %v3284_v36 = vpop.xlane.xlu0 %1116 }
 0x319   :  { %3598 = vst [vmem:[#allocation26_spill] sm:$0xff] %v3284_v36  ;;  %1788 = vpow2.f32 %v1180_v23 }
 0x31a   :  { %1790 = vlog2.f32 %v1198_v59  ;;  %v1144_v59 = vsub.f32 %v3110_v3, %v3284_v36  ;;  %v3608_v3 = vld [vmem:[#allocation30_spill] sm:$0xff]  ;;  %v3613_v36 = vld [vmem:[#allocation39_spill] sm:$0xff] }
 0x31b   :  { %1792 = vpow2.f32 %v1186_v2 }
 0x31d   :  { %1269 = vadd.xlane.f32.xlu0 %v1268_v8  ;;  %1387 = vadd.xlane.f32.xlu1 %v1386_v56  ;;  %v1401_v8 = vsel %vm243_vm0, %v1356_v58, 0.0  ;;  %v3310_v19 = vpop.xlane.xlu2 %1224 }
 0x31f   :  { %v1789_v14 = vpop.eup %1788 }
 0x320   :  { %v1201_v44 = vpop.xlane.xlu0 %1200  ;;  %v1247_v30 = vsel %vm243_vm0, %v1789_v14, 0.0  ;;  %v1791_v23 = vpop.eup %1790 }
 0x321   :  { %1794 = vlog2.f32 %v1201_v44  ;;  %v1793_v4 = vpop.eup %1792  ;;  %v1272_v43 = vmul.f32 0.6931472, %v1791_v23  ;;  %v1192_v44 = vmul.f32 1.442695, %v1144_v59  ;;  %v3606_v23 = vld [vmem:[#allocation19_spill] sm:$0xff] }
 0x322   :  { %v1256_v14 = vsel %vm243_vm0, %v1793_v4, 0.0  ;;  %v1362_v37 = vmul.f32 %v3606_v23, %v2918_v18  ;;  %v3609_v18 = vld [vmem:[#allocation23_spill] sm:$0xff] }
 0x323   :  { %1796 = vpow2.f32 %v1192_v44 }
 0x324   :  { %v1419_v4 = vsel %vm243_vm0, %v1362_v37, 0.0  ;;  %1798 = vlog2.f32 %v3288_v10 }
 0x325   :  { %1435 = vadd.xlane.f32.xlu0 %v1434_v12  ;;  %1396 = vadd.xlane.f32.xlu1 %v1395_v40  ;;  %v3317_v41 = vpop.xlane.xlu2 %1233  ;;  %v3603_v12 = vld [vmem:[#allocation16_spill] sm:$0xff] }
 0x326   :  { %v1359_v40 = vmul.f32 %v3603_v12, %v2911_v52  ;;  %v3605_v12 = vld [vmem:[#allocation38_spill] sm:$0xff] }
 0x327   :  { %v1795_v58 = vpop.eup %1794 }
 0x328   :  { %v3302_v56 = vpop.xlane.xlu0 %1209  ;;  %v1410_v6 = vsel %vm243_vm0, %v1359_v40, 0.0  ;;  %v1274_v52 = vmul.f32 0.6931472, %v1795_v58 }
 0x329   :  { %1800 = vlog2.f32 %v3302_v56 }
 0x32a   :  { %v1322_v40 = vadd.f32 %v1274_v52, %v3605_v12 }
 0x32d   :  { %1444 = vadd.xlane.f32.xlu0 %v1443_v11  ;;  %1402 = vadd.xlane.f32.xlu1 %v1401_v8  ;;  %v1373_v8 = vpop.xlane.xlu2 %1372 }
 0x330   :  { %v3312_v54 = vpop.xlane.xlu0 %1218 }
 0x335   :  { %1248 = vadd.xlane.f32.xlu1 %v1247_v30  ;;  %v1321_v30 = vadd.f32 %v1272_v43, %v3604_v33  ;;  %v1365_v33 = vmul.f32 %v3609_v18, %v2925_v20  ;;  %v1382_v52 = vpop.xlane.xlu2 %1381 }
 0x337   :  { %v1446_v2 = vsub.f32 %v1321_v30, %v1373_v8  ;;  %v1797_v8 = vpop.eup %1796 }
 0x338   :  { %v3319_v62 = vpop.xlane.xlu0 %1227 }
 0x339   :  { %v1553_v50 = vmul.f32 %v3607_v34, %v1446_v2  ;;  %v1428_v34 = vsel %vm243_vm0, %v1365_v33, 0.0 }
 0x33b   :  { %v1578_v43 = vsel %vm243_vm0, %v1553_v50, 0.0 }
 0x33d   :  { %1411 = vadd.xlane.f32.xlu1 %v1410_v6 }
 0x340   :  { %v3324_v11 = vpop.xlane.xlu0 %1236 }
 0x345   :  { %1257 = vadd.xlane.f32.xlu1 %v1256_v14  ;;  %v1265_v14 = vsel %vm243_vm0, %v1797_v8, 0.0 }
 0x348   :  { %v1376_v6 = vpop.xlane.xlu0 %1375 }
 0x349   :  { %v1447_v5 = vsub.f32 %v1322_v40, %v1376_v6  ;;  %v1799_v40 = vpop.eup %1798 }
 0x34a   :  { %v1801_v6 = vpop.eup %1800 }
 0x34b   :  { %v1554_v53 = vmul.f32 %v3608_v3, %v1447_v5  ;;  %v3610_v5 = vld [vmem:[#allocation25_spill] sm:$0xff] }
 0x34c   :  { %v1368_v37 = vmul.f32 %v3610_v5, %v2932_v63  ;;  %v1391_v63 = vpop.xlane.xlu2 %1390 }
 0x34d   :  { %v1579_v58 = vsel %vm243_vm0, %v1554_v53, 0.0  ;;  %1420 = vadd.xlane.f32.xlu1 %v1419_v4  ;;  %v1278_v4 = vmul.f32 0.6931472, %v1799_v40 }
 0x34e   :  { %v1580_v59 = vadd.f32 %v1579_v58, %v1578_v43  ;;  %v1437_v50 = vsel %vm243_vm0, %v1368_v37, 0.0  ;;  %v1280_v43 = vmul.f32 0.6931472, %v1801_v6  ;;  %v3611_v58 = vld [vmem:[#allocation36_spill] sm:$0xff] }
 0x34f   :  { %v1324_v8 = vadd.f32 %v1278_v4, %v3611_v58  ;;  %v3612_v4 = vld [vmem:[#allocation45_spill] sm:$0xff] }
 0x350   :  { %v1385_v2 = vpop.xlane.xlu0 %1384 }
 0x355   :  { %1266 = vadd.xlane.f32.xlu1 %v1265_v14  ;;  %v1400_v14 = vpop.xlane.xlu2 %1399 }
 0x358   :  { %v1394_v12 = vpop.xlane.xlu0 %1393 }
 0x35d   :  { %1429 = vadd.xlane.f32.xlu1 %v1428_v34  ;;  %v1449_v34 = vsub.f32 %v1324_v8, %v1382_v52  ;;  %v3614_v8 = vld [vmem:[#allocation14_spill] sm:$0xff] }
 0x35f   :  { %v1556_v40 = vmul.f32 %v2645_v28, %v1449_v34 }
 0x360   :  { %v1204_v30 = vpop.xlane.xlu1 %1203  ;;  %v3357_v18 = vpop.xlane.xlu0 %1242 }
 0x361   :  { %1802 = vlog2.f32 %v1204_v30  ;;  %v1325_v30 = vadd.f32 %v1280_v43, %v3026_v45 }
 0x362   :  { %1804 = vlog2.f32 %v3298_v27 }
 0x363   :  { %1806 = vlog2.f32 %v3312_v54 }
 0x365   :  { %1438 = vadd.xlane.f32.xlu1 %v1437_v50  ;;  %v1450_v50 = vsub.f32 %v1325_v30, %v1385_v2  ;;  %v1246_v2 = vpop.xlane.xlu2 %1245 }
 0x367   :  { %v1803_v23 = vpop.eup %1802  ;;  %v1557_v45 = vmul.f32 %v3614_v8, %v1450_v50 }
 0x368   :  { %v1213_v53 = vpop.xlane.xlu1 %1212  ;;  %v1276_v10 = vmul.f32 0.6931472, %v1803_v23  ;;  %v1805_v56 = vpop.eup %1804 }
 0x369   :  { %1808 = vlog2.f32 %v1213_v53  ;;  %v1807_v33 = vpop.eup %1806  ;;  %v1284_v54 = vmul.f32 0.6931472, %v1805_v56  ;;  %v3370_v34 = vpop.xlane.xlu0 %1405 }
 0x36a   :  { %v1323_v27 = vadd.f32 %v1276_v10, %v3213_v13  ;;  %1810 = vlog2.f32 %v3310_v19  ;;  %v1286_v6 = vmul.f32 0.6931472, %v1807_v33  ;;  %v1583_v19 = vsel %vm243_vm0, %v1556_v40, 0.0 }
 0x36b   :  { %v1327_v52 = vadd.f32 %v1284_v54, %v3613_v36 }
 0x36d   :  { %v1452_v56 = vsub.f32 %v1327_v52, %v1391_v63 }
 0x36f   :  { %v1809_v5 = vpop.eup %1808  ;;  %v1559_v63 = vmul.f32 %v2675_v55, %v1452_v56 }
 0x370   :  { %v1222_v20 = vpop.xlane.xlu1 %1221  ;;  %v1282_v23 = vmul.f32 0.6931472, %v1809_v5  ;;  %v1811_v43 = vpop.eup %1810  ;;  %v1585_v5 = vsel %vm243_vm0, %v1557_v45, 0.0 }
 0x371   :  { %1812 = vlog2.f32 %v1222_v20  ;;  %v1328_v20 = vadd.f32 %v1286_v6, %v3049_v31  ;;  %v1290_v36 = vmul.f32 0.6931472, %v1811_v43  ;;  %v1409_v45 = vpop.xlane.xlu2 %1408 }
 0x372   :  { %v1326_v28 = vadd.f32 %v1282_v23, %v3227_v39  ;;  %1814 = vlog2.f32 %v3319_v62 }
 0x377   :  { %v1813_v33 = vpop.eup %1812 }
 0x378   :  { %v3349_v44 = vpop.xlane.xlu1 %1230  ;;  %v1288_v50 = vmul.f32 0.6931472, %v1813_v33  ;;  %v1815_v52 = vpop.eup %1814 }
 0x379   :  { %1816 = vlog2.f32 %v3349_v44 }
 0x37a   :  { %1818 = vlog2.f32 %v3317_v41 }
 0x37b   :  { %1820 = vlog2.f32 %v3324_v11  ;;  %v3616_v11 = vld [vmem:[#allocation9_spill] sm:$0xff] }
 0x380   :  { %v3353_v3 = vpop.xlane.xlu1 %1239 }
 0x381   :  { %1822 = vlog2.f32 %v3353_v3 }
 0x382   :  { %1824 = vlog2.f32 %v3357_v18 }
 0x383   :  { %1826 = vlog2.f32 %v1246_v2 }
 0x388   :  { %v1379_v37 = vpop.xlane.xlu1 %1378 }
 0x389   :  { %v1448_v53 = vsub.f32 %v1323_v27, %v1379_v37  ;;  %v1453_v37 = vsub.f32 %v1328_v20, %v1394_v12  ;;  %v1329_v12 = vadd.f32 %v1288_v50, %v3238_v22 }
 0x38b   :  { %v1555_v58 = vmul.f32 %v3612_v4, %v1448_v53  ;;  %v3615_v53 = vld [vmem:[#allocation42_spill] sm:$0xff]  ;;  %v1560_v40 = vmul.f32 %v2715_v57, %v1453_v37  ;;  %v1589_v4 = vsel %vm243_vm0, %v1559_v63, 0.0  ;;  %v1292_v57 = vmul.f32 0.6931472, %v1815_v52 }
 0x38c   :  { %v1330_v39 = vadd.f32 %v1290_v36, %v3615_v53 }
 0x38d   :  { %v1581_v13 = vsel %vm243_vm0, %v1555_v58, 0.0  ;;  %v1591_v55 = vsel %vm243_vm0, %v1560_v40, 0.0  ;;  %v1331_v22 = vadd.f32 %v1292_v57, %v3070_v38 }
 0x38e   :  { %v1582_v10 = vadd.f32 %v1581_v13, %v1580_v59  ;;  %v1455_v58 = vsub.f32 %v1330_v39, %v1400_v14 }
 0x390   :  { %v1584_v30 = vadd.f32 %v1583_v19, %v1582_v10  ;;  %v1388_v27 = vpop.xlane.xlu1 %1387  ;;  %v1562_v10 = vmul.f32 %v2708_v35, %v1455_v58 }
 0x391   :  { %v1451_v54 = vsub.f32 %v1326_v28, %v1388_v27  ;;  %v1255_v27 = vpop.xlane.xlu2 %1254 }
 0x392   :  { %v1586_v59 = vadd.f32 %v1585_v5, %v1584_v30  ;;  %v1595_v14 = vsel %vm243_vm0, %v1562_v10, 0.0 }
 0x393   :  { %v1558_v31 = vmul.f32 %v2655_v47, %v1451_v54  ;;  %v1252_v47 = vpop.xlane.xlu0 %1251 }
 0x395   :  { %v1587_v6 = vsel %vm243_vm0, %v1558_v31, 0.0 }
 0x396   :  { %v1588_v23 = vadd.f32 %v1587_v6, %v1586_v59 }
 0x398   :  { %v1590_v62 = vadd.f32 %v1589_v4, %v1588_v23  ;;  %v1397_v8 = vpop.xlane.xlu1 %1396 }
 0x399   :  { %v1454_v13 = vsub.f32 %v1329_v12, %v1397_v8  ;;  %v1418_v63 = vpop.xlane.xlu2 %1417 }
 0x39a   :  { %v1592_v43 = vadd.f32 %v1591_v55, %v1590_v62 }
 0x39b   :  { %v1561_v19 = vmul.f32 %v2685_v7, %v1454_v13  ;;  %v1415_v5 = vpop.xlane.xlu0 %1414  ;;  %v1817_v7 = vpop.eup %1816 }
 0x39c   :  { %v1294_v59 = vmul.f32 0.6931472, %v1817_v7  ;;  %v1819_v38 = vpop.eup %1818 }
 0x39d   :  { %v1593_v56 = vsel %vm243_vm0, %v1561_v19, 0.0  ;;  %v1821_v50 = vpop.eup %1820  ;;  %v1296_v53 = vmul.f32 0.6931472, %v1819_v38 }
 0x39e   :  { %v1594_v20 = vadd.f32 %v1593_v56, %v1592_v43  ;;  %v1332_v31 = vadd.f32 %v1294_v59, %v3252_v0  ;;  %v1298_v39 = vmul.f32 0.6931472, %v1821_v50  ;;  %v1823_v40 = vpop.eup %1822 }
 0x39f   :  { %v1333_v6 = vadd.f32 %v1296_v53, %v3616_v11  ;;  %v1300_v23 = vmul.f32 0.6931472, %v1823_v40  ;;  %v1825_v4 = vpop.eup %1824 }
 0x3a0   :  { %v1403_v28 = vpop.xlane.xlu1 %1402  ;;  %v1596_v33 = vadd.f32 %v1595_v14, %v1594_v20  ;;  %v1457_v41 = vsub.f32 %v1332_v31, %v3370_v34  ;;  %v1334_v3 = vadd.f32 %v1298_v39, %v3099_v49  ;;  %v1827_v18 = vpop.eup %1826  ;;  %v1302_v55 = vmul.f32 0.6931472, %v1825_v4 }
 0x3a1   :  { %v1456_v30 = vsub.f32 %v1331_v22, %v1403_v28  ;;  %v1458_v58 = vsub.f32 %v1333_v6, %v1409_v45  ;;  %v1264_v12 = vpop.xlane.xlu2 %1263  ;;  %v1335_v2 = vadd.f32 %v1300_v23, %v3260_v42  ;;  %v1304_v34 = vmul.f32 0.6931472, %v1827_v18  ;;  %v3617_v42 = vld [vmem:[#allocation46_spill] sm:$0xff] }
 0x3a2   :  { %v1564_v0 = vmul.f32 %v2712_v26, %v1457_v41  ;;  %v1336_v57 = vadd.f32 %v1302_v55, %v3188_v48 }
 0x3a3   :  { %v1563_v36 = vmul.f32 %v2745_v46, %v1456_v30  ;;  %v1261_v44 = vpop.xlane.xlu0 %1260  ;;  %v1565_v13 = vmul.f32 %v2738_v60, %v1458_v58  ;;  %v1460_v26 = vsub.f32 %v1335_v2, %v1415_v5  ;;  %v1337_v14 = vadd.f32 %v1304_v34, %v3617_v42 }
 0x3a4   :  { %v1599_v43 = vsel %vm243_vm0, %v1564_v0, 0.0  ;;  %v1461_v28 = vsub.f32 %v1336_v57, %v1418_v63 }
 0x3a5   :  { %v1597_v35 = vsel %vm243_vm0, %v1563_v36, 0.0  ;;  %v1601_v56 = vsel %vm243_vm0, %v1565_v13, 0.0 }
 0x3a6   :  { %v1598_v37 = vadd.f32 %v1597_v35, %v1596_v33  ;;  %v1567_v33 = vmul.f32 %v2742_v24, %v1460_v26  ;;  %v1568_v7 = vmul.f32 %v2765_v1, %v1461_v28 }
 0x3a8   :  { %v1249_v54 = vpop.xlane.xlu1 %1248  ;;  %v1600_v45 = vadd.f32 %v1599_v43, %v1598_v37 }
 0x3a9   :  { %1828 = vlog2.f32 %v1249_v54  ;;  %v1427_v30 = vpop.xlane.xlu2 %1426  ;;  %v1605_v54 = vsel %vm243_vm0, %v1567_v33, 0.0 }
 0x3aa   :  { %1830 = vlog2.f32 %v1252_v47  ;;  %v1602_v22 = vadd.f32 %v1601_v56, %v1600_v45 }
 0x3ab   :  { %v1424_v62 = vpop.xlane.xlu0 %1423 }
 0x3af   :  { %v1829_v10 = vpop.eup %1828 }
 0x3b0   :  { %v1412_v46 = vpop.xlane.xlu1 %1411  ;;  %v1831_v19 = vpop.eup %1830  ;;  %v1306_v20 = vmul.f32 0.6931472, %v1829_v10  ;;  %v3619_v10 = vld [vmem:[#allocation21_spill] sm:$0xff] }
 0x3b1   :  { %v1459_v52 = vsub.f32 %v1334_v3, %v1412_v46  ;;  %v1308_v36 = vmul.f32 0.6931472, %v1831_v19  ;;  %v1607_v46 = vsel %vm243_vm0, %v1568_v7, 0.0  ;;  %v1433_v40 = vpop.xlane.xlu2 %1432 }
 0x3b2   :  { %v1338_v35 = vadd.f32 %v1306_v20, %v3270_v51  ;;  %v3620_v20 = vld [vmem:[#allocation47_spill] sm:$0xff] }
 0x3b3   :  { %v1566_v49 = vmul.f32 %v2778_v15, %v1459_v52  ;;  %v1270_v48 = vpop.xlane.xlu0 %1269  ;;  %v1339_v38 = vadd.f32 %v1308_v36, %v3225_v32 }
 0x3b4   :  { %v1463_v24 = vsub.f32 %v1338_v35, %v1424_v62  ;;  %v3624_v35 = vld [vmem:[#allocation27_spill] sm:$0xff] }
 0x3b5   :  { %v1603_v47 = vsel %vm243_vm0, %v1566_v49, 0.0  ;;  %v1464_v1 = vsub.f32 %v1339_v38, %v1427_v30 }
 0x3b6   :  { %v1604_v5 = vadd.f32 %v1603_v47, %v1602_v22  ;;  %v3621_v47 = vld [vmem:[#allocation22_spill] sm:$0xff] }
 0x3b7   :  { %v1571_v4 = vmul.f32 %v2800_v16, %v1464_v1  ;;  %v3618_v16 = vld [vmem:[#allocation26_spill] sm:$0xff] }
 0x3b8   :  { %v1258_v8 = vpop.xlane.xlu1 %1257  ;;  %v1606_v63 = vadd.f32 %v1605_v54, %v1604_v5  ;;  %v3625_v54 = vld [vmem:[#allocation28_spill] sm:$0xff] }
 0x3b9   :  { %1832 = vlog2.f32 %v1258_v8  ;;  %v1613_v34 = vsel %vm243_vm0, %v1571_v4, 0.0  ;;  %v1442_v26 = vpop.xlane.xlu2 %1441 }
 0x3ba   :  { %1834 = vlog2.f32 %v1255_v27  ;;  %v1608_v53 = vadd.f32 %v1607_v46, %v1606_v63 }
 0x3bb   :  { %1836 = vlog2.f32 %v1261_v44  ;;  %v1436_v41 = vpop.xlane.xlu0 %1435 }
 0x3bc   :  { %1838 = vlog2.f32 %v1264_v12 }
 0x3bd   :  { %1840 = vlog2.f32 %v1270_v48  ;;  %v3623_v48 = vld [vmem:[#allocation32_spill] sm:$0xff] }
 0x3bf   :  { %v1833_v37 = vpop.eup %1832 }
 0x3c0   :  { %v1421_v60 = vpop.xlane.xlu1 %1420  ;;  %v1312_v27 = vmul.f32 0.6931472, %v1833_v37  ;;  %v1835_v50 = vpop.eup %1834 }
 0x3c1   :  { %v1462_v15 = vsub.f32 %v1337_v14, %v1421_v60  ;;  %v1837_v44 = vpop.eup %1836  ;;  %v1310_v39 = vmul.f32 0.6931472, %v1835_v50  ;;  %v3622_v14 = vld [vmem:[#allocation34_spill] sm:$0xff] }
 0x3c2   :  { %v1341_v32 = vadd.f32 %v1312_v27, %v3276_v9  ;;  %v1839_v6 = vpop.eup %1838  ;;  %v1314_v23 = vmul.f32 0.6931472, %v1837_v44 }
 0x3c3   :  { %v1569_v59 = vmul.f32 %v2809_v25, %v1462_v15  ;;  %v1570_v25 = vmul.f32 %v2775_v61, %v1463_v24  ;;  %v1841_v3 = vpop.eup %1840  ;;  %v1340_v52 = vadd.f32 %v1310_v39, %v3145_v21  ;;  %v1316_v55 = vmul.f32 0.6931472, %v1839_v6  ;;  %v1445_v19 = vpop.xlane.xlu0 %1444 }
 0x3c4   :  { %v1466_v12 = vsub.f32 %v1341_v32, %v1433_v40  ;;  %v1342_v61 = vadd.f32 %v1314_v23, %v3250_v17  ;;  %v1320_v2 = vmul.f32 0.6931472, %v1841_v3 }
 0x3c5   :  { %v1609_v51 = vsel %vm243_vm0, %v1569_v59, 0.0  ;;  %v1611_v0 = vsel %vm243_vm0, %v1570_v25, 0.0  ;;  %v1343_v17 = vadd.f32 %v1316_v55, %v3620_v20 }
 0x3c6   :  { %v1610_v11 = vadd.f32 %v1609_v51, %v1608_v53  ;;  %v1467_v13 = vsub.f32 %v1342_v61, %v1436_v41  ;;  %v1573_v43 = vmul.f32 %v2806_v29, %v1466_v12  ;;  %v1345_v22 = vadd.f32 %v1320_v2, %v3622_v14 }
 0x3c8   :  { %v1267_v31 = vpop.xlane.xlu1 %1266  ;;  %v1612_v18 = vadd.f32 %v1611_v0, %v1610_v11  ;;  %v1574_v42 = vmul.f32 %v3621_v47, %v1467_v13  ;;  %v1617_v28 = vsel %vm243_vm0, %v1573_v43, 0.0  ;;  %v1470_v15 = vsub.f32 %v1345_v22, %v1445_v19 }
 0x3c9   :  { %1842 = vlog2.f32 %v1267_v31 }
 0x3ca   :  { %v1614_v57 = vadd.f32 %v1613_v34, %v1612_v18  ;;  %v1619_v36 = vsel %vm243_vm0, %v1574_v42, 0.0  ;;  %v1577_v59 = vmul.f32 %v3625_v54, %v1470_v15 }
 0x3cc   :  { %v1625_v50 = vsel %vm243_vm0, %v1577_v59, 0.0 }
 0x3cf   :  { %v1843_v58 = vpop.eup %1842 }
 0x3d0   :  { %v1318_v62 = vmul.f32 0.6931472, %v1843_v58  ;;  %v1430_v8 = vpop.xlane.xlu1 %1429 }
 0x3d1   :  { %v1465_v9 = vsub.f32 %v1340_v52, %v1430_v8 }
 0x3d2   :  { %v1344_v49 = vadd.f32 %v1318_v62, %v3618_v16 }
 0x3d3   :  { %v1572_v45 = vmul.f32 %v3619_v10, %v1465_v9 }
 0x3d4   :  { %v1469_v60 = vsub.f32 %v1344_v49, %v1442_v26 }
 0x3d5   :  { %v1615_v21 = vsel %vm243_vm0, %v1572_v45, 0.0 }
 0x3d6   :  { %v1616_v56 = vadd.f32 %v1615_v21, %v1614_v57  ;;  %v1576_v5 = vmul.f32 %v3623_v48, %v1469_v60 }
 0x3d8   :  { %v1618_v29 = vadd.f32 %v1617_v28, %v1616_v56  ;;  %v1439_v33 = vpop.xlane.xlu1 %1438  ;;  %v1623_v24 = vsel %vm243_vm0, %v1576_v5, 0.0 }
 0x3d9   :  { %v1468_v30 = vsub.f32 %v1343_v17, %v1439_v33 }
 0x3da   :  { %v1620_v7 = vadd.f32 %v1619_v36, %v1618_v29 }
 0x3db   :  { %v1575_v37 = vmul.f32 %v3624_v35, %v1468_v30 }
 0x3dd   :  { %v1621_v38 = vsel %vm243_vm0, %v1575_v37, 0.0 }
 0x3de   :  { %v1622_v63 = vadd.f32 %v1621_v38, %v1620_v7 }
 0x3e0   :  { %v1624_v27 = vadd.f32 %v1623_v24, %v1622_v63 }
 0x3e2   :  { %v1626_v31 = vadd.f32 %v1625_v50, %v1624_v27 }
 0x3e4   :  { %v1627_v46 = vrot.slane %v1626_v31, 4 }
 0x3e6   :  { %v1628_v51 = vadd.f32 %v1627_v46, %v1626_v31 }
 0x3e8   :  { %v1629_v44 = vrot.slane %v1628_v51, 2 }
 0x3ea   :  { %v1630_v1 = vadd.f32 %v1629_v44, %v1628_v51 }
 0x3ec   :  { %v1631_v53 = vrot.slane %v1630_v1, 1 }
 0x3ee   :  { %v1632_v39 = vadd.f32 %v1631_v53, %v1630_v1 }
 0x3f0   :  { %1633 = vst.msk [vmem:[#allocation4] sm:$0x1] %vm1551_vm11, %v1632_v39 }
 0x3f1   :  { %1655 = dma.vmem_to_hbm [thread:$0]  %s1651_s8, 16, %s1653_s10, [#allocation5]  }
 0x3f2   :  { %1893 = dma.done.wait [#allocation3], 16  }
 0x3f3   :  { %1894 = vsyncadd [#allocation3], 4294967280 }
 0x3f4   :  { %1895 = dma.done.wait [#allocation5], 16  }
 0x3f5   :  { %1896 = vsyncadd [#allocation5], 4294967280 }
 0x3f6   :  { %1664 = vsyncpa [#allocation3], 1 }
 0x3f7   :  { %1665 = vsyncpa [#allocation5], 1 }

</bundles_post_ra>
